<compile_context>
chip_gen: v6e
topology: v6e:2x2x1
jax: 0.10.0
libtpu: 0.0.40
codegen_flags: <defaults>
</compile_context>

<pallas_src>
import functools

import jax
import jax.numpy as jnp
from jax import lax
from jax.experimental import pallas as pl
from jax.experimental.pallas import tpu as pltpu


# ------------------------------ Pallas kernel ------------------------------- #

def _fused_rnn_fc_kernel(x_ref, *refs, num_layers, compute_dtype):
    """One time-chunk of an L-layer tanh RNN + final Linear.

    x_ref:            (Tc, Bp, P0)   this chunk's padded input           (VMEM)
    refs[0:L]         wih_l          (P0, Ph) for l==0, (Ph, Ph) otherwise
    refs[L:2L]        whh_l          (Ph, Ph)
    refs[2L:3L]       b_l            (1, Ph)   combined bias (b_ih + b_hh)
    refs[3L]          fcw            (Ph, Cp)
    refs[3L+1]        fcb            (1, Cp)
    refs[3L+2]        out_ref        (Bp, Cp)  logits (written on last chunk)
    refs[3L+3]        seq_ref        (Tc, Bp, Ph) scratch: pre-activations, then
                                     the current layer's hidden sequence (aliased)
    refs[3L+4]        h_ref          (L, Bp, Ph)  persistent per-layer hidden state
    """
    L = num_layers
    wih_refs = refs[0:L]
    whh_refs = refs[L:2 * L]
    b_refs = refs[2 * L:3 * L]
    fcw_ref = refs[3 * L]
    fcb_ref = refs[3 * L + 1]
    out_ref = refs[3 * L + 2]
    seq_ref = refs[3 * L + 3]
    h_ref = refs[3 * L + 4]

    Tc, Bp, _ = x_ref.shape
    Ph = seq_ref.shape[-1]
    cdt = compute_dtype

    c = pl.program_id(0)
    n_chunks = pl.num_programs(0)

    @pl.when(c == 0)
    def _init():
        h_ref[...] = jnp.zeros_like(h_ref)

    for l in range(L):                                   # static (small) layer loop
        # ---- hoisted input projection: ONE MXU GEMM over the whole chunk ----
        inp = x_ref[...] if l == 0 else seq_ref[...]
        inp2d = inp.reshape(Tc * Bp, inp.shape[-1])
        pre = (jnp.dot(inp2d, wih_refs[l][...],
                       preferred_element_type=jnp.float32)
               + b_refs[l][...])                         # bias added once per chunk
        # Alias the pre-activations into seq_ref (read of slot t happens before
        # the recurrence overwrites it below).
        seq_ref[...] = pre.reshape(Tc, Bp, Ph).astype(cdt)

        whh = whh_refs[l][...]                           # hoisted weight load
        is_last = (l == L - 1)

        def step(t, h, whh=whh, is_last=is_last):
            h_new = jnp.tanh(
                seq_ref[t].astype(jnp.float32)           # read pre slot t FIRST
                + jnp.dot(h, whh, preferred_element_type=jnp.float32)
            ).astype(cdt)
            if not is_last:                              # last layer: only h_T needed
                seq_ref[t] = h_new                       # overwrite slot t after read
            return h_new

        h_fin = lax.fori_loop(0, Tc, step, h_ref[l], unroll=min(Tc, 8))
        h_ref[l] = h_fin                                 # carry across chunks

    # ---- final FC on the last layer's terminal hidden state, last chunk only ----
    @pl.when(c == n_chunks - 1)
    def _finalize():
        out_ref[...] = (jnp.dot(h_ref[L - 1], fcw_ref[...],
                                preferred_element_type=jnp.float32)
                        + fcb_ref[...]).astype(out_ref.dtype)


# ------------------------------ JAX wrapper --------------------------------- #

_LANE = 128   # lane width (last dim)
_SUB = 8      # f32 sublane width (second-to-last dim)


def _round_up(n, m):
    return ((n + m - 1) // m) * m


def _pad_to(a, shape):
    return jnp.pad(a, [(0, s - d) for d, s in zip(a.shape, shape)])


def _pick_chunk(t, target=128):
    """Largest divisor of t that is <= target (keeps per-chunk VMEM bounded)."""
    if t <= target:
        return t
    best = 1
    for d in range(1, t + 1):
        if t % d == 0 and d <= target:
            best = d
    return best


def _resident_spec(arr):
    nd = arr.ndim
    return pl.BlockSpec(arr.shape, lambda c: (0,) * nd)   # whole array, VMEM-resident


@functools.partial(jax.jit, static_argnames=("compute_dtype",))
def rnn_forward(x, params, compute_dtype=jnp.bfloat16):
    """x: (B, T, input_size) batch-first (PyTorch convention). Returns (B, num_classes) f32."""
    layers = params["layers"]                    # [(w_ih (H,Din_l), w_hh (H,H), b (H,)), ...]
    fc_w, fc_b = params["fc_w"], params["fc_b"]  # (C, H), (C,)
    B, T, D_in = x.shape
    L = len(layers)
    H = layers[0][1].shape[0]
    C = fc_w.shape[0]
    cdt = compute_dtype

    P0 = _round_up(D_in, _LANE)   # layer-0 contraction width (NOT inflated to Ph)
    Ph = _round_up(H, _LANE)      # hidden width for all other contractions
    Bp = _round_up(B, _SUB)
    Cp = _round_up(C, _LANE)

    Tc = _pick_chunk(T)
    n_chunks = T // Tc

    # time-major, zero-padded input (zero padding is exact: padded weight rows are 0)
    x_tm = jnp.transpose(x, (1, 0, 2)).astype(cdt)
    x_p = _pad_to(x_tm, (T, Bp, P0))

    # pre-transposed, zero-padded per-layer weights (unstacked: per-layer widths differ)
    wih = [_pad_to(w_ih.T.astype(cdt), (P0 if i == 0 else Ph, Ph))
           for i, (w_ih, _, _) in enumerate(layers)]
    whh = [_pad_to(w_hh.T.astype(cdt), (Ph, Ph)) for (_, w_hh, _) in layers]
    bias = [_pad_to(b[None, :].astype(cdt), (1, Ph)) for (_, _, b) in layers]
    fcw = _pad_to(fc_w.T.astype(cdt), (Ph, Cp))
    fcb = _pad_to(fc_b[None, :].astype(cdt), (1, Cp))

    operands = [x_p, *wih, *whh, *bias, fcw, fcb]

    in_specs = [pl.BlockSpec((Tc, Bp, P0), lambda c: (c, 0, 0))]   # streamed x chunk
    in_specs += [_resident_spec(a) for a in operands[1:]]          # weights stay resident

    # VMEM budget sized to the actual resident set (x chunk + weights double-buffered,
    # scratch, output) with headroom; avoids the 16/32 MiB default scoped limit issues.
    isz = jnp.dtype(cdt).itemsize
    weight_bytes = sum(int(a.size) * a.dtype.itemsize for a in operands[1:])
    x_chunk_bytes = Tc * Bp * P0 * isz
    scratch_bytes = (Tc * Bp * Ph + L * Bp * Ph) * isz
    out_bytes = Bp * Cp * 4
    resident = 2 * x_chunk_bytes + 2 * weight_bytes + scratch_bytes + 2 * out_bytes
    vmem_limit = int(min(100 * 2**20, max(2 * resident, 8 * 2**20)))

    kernel = functools.partial(_fused_rnn_fc_kernel, num_layers=L, compute_dtype=cdt)

    out_p = pl.pallas_call(
        kernel,
        out_shape=jax.ShapeDtypeStruct((Bp, Cp), jnp.float32),
        grid_spec=pltpu.PrefetchScalarGridSpec(
            num_scalar_prefetch=0,
            grid=(n_chunks,),
            in_specs=in_specs,
            out_specs=pl.BlockSpec((Bp, Cp), lambda c: (0, 0)),
            scratch_shapes=[
                pltpu.VMEM((Tc, Bp, Ph), cdt),   # pre-activations / hidden sequence (aliased)
                pltpu.VMEM((L, Bp, Ph), cdt),    # per-layer hidden state, persists across chunks
            ]),
        compiler_params=pltpu.CompilerParams(
            dimension_semantics=("arbitrary",),   # serial recurrence over time chunks
            vmem_limit_bytes=vmem_limit),
    )(*operands)

    return out_p[:B, :C]


def init_params(key, input_size, hidden_size, num_layers, num_classes):
    """Deterministic init mimicking PyTorch's U(-1/sqrt(H), 1/sqrt(H)); biases pre-folded."""
    bound = 1.0 / (hidden_size ** 0.5)
    layers = []
    for l in range(num_layers):
        d_in = input_size if l == 0 else hidden_size
        key, k1, k2, k3, k4 = jax.random.split(key, 5)
        w_ih = jax.random.uniform(k1, (hidden_size, d_in), jnp.float32, -bound, bound)
        w_hh = jax.random.uniform(k2, (hidden_size, hidden_size), jnp.float32, -bound, bound)
        b_ih = jax.random.uniform(k3, (hidden_size,), jnp.float32, -bound, bound)
        b_hh = jax.random.uniform(k4, (hidden_size,), jnp.float32, -bound, bound)
        layers.append((w_ih, w_hh, b_ih + b_hh))   # bias folding is exact for tanh RNN
    key, k5, k6 = jax.random.split(key, 3)
    fc_w = jax.random.uniform(k5, (num_classes, hidden_size), jnp.float32, -bound, bound)
    fc_b = jax.random.uniform(k6, (num_classes,), jnp.float32, -bound, bound)
    return {"layers": layers, "fc_w": fc_w, "fc_b": fc_b}


# --------------------------- pure-JAX reference ----------------------------- #

def _reference(x, params):
    seq = jnp.transpose(x, (1, 0, 2)).astype(jnp.float32)
    B = seq.shape[1]
    for (w_ih, w_hh, b) in params["layers"]:
        H = w_hh.shape[0]

        def step(h, x_t, w_ih=w_ih, w_hh=w_hh, b=b):
            h_new = jnp.tanh(x_t @ w_ih.T + h @ w_hh.T + b)
            return h_new, h_new

        _, seq = lax.scan(step, jnp.zeros((B, H), jnp.float32), seq)
    return seq[-1] @ params["fc_w"].T + params["fc_b"]


# ----------------------------------- main ----------------------------------- #

if __name__ == "__main__":
    batch, seq_len = 2, 8
    input_size, hidden_size, num_layers, num_classes = 16, 32, 2, 10

    key = jax.random.PRNGKey(0)
    k_x, k_p = jax.random.split(key)
    x = jax.random.normal(k_x, (batch, seq_len, input_size), jnp.float32)
    params = init_params(k_p, input_size, hidden_size, num_layers, num_classes)

    ref = _reference(x, params)

    # f32 path: tight check of the kernel logic.
    out_f32 = jax.block_until_ready(rnn_forward(x, params, compute_dtype=jnp.float32))
    assert out_f32.shape == (batch, num_classes)
    assert jnp.allclose(out_f32, ref, atol=2e-3, rtol=2e-3), "f32 kernel mismatch vs reference"

    # bf16 path (default, MXU-friendly): looser check for dtype plumbing only.
    out_bf16 = jax.block_until_ready(rnn_forward(x, params))
    assert out_bf16.shape == (batch, num_classes)
    assert jnp.allclose(out_bf16, ref, atol=1e-1, rtol=1e-1), "bf16 kernel mismatch vs reference"

    print("KERNEL_OK")
</pallas_src>

<mosaic_0001>
module attributes {stable_mosaic.version = 11 : i64} {
  func.func @_fused_rnn_fc_kernel(%arg0: i32, %arg1: memref<8x8x128xf32, #tpu.memory_space<vmem>>, %arg2: memref<128x128xf32, #tpu.memory_space<vmem>>, %arg3: memref<128x128xf32, #tpu.memory_space<vmem>>, %arg4: memref<128x128xf32, #tpu.memory_space<vmem>>, %arg5: memref<128x128xf32, #tpu.memory_space<vmem>>, %arg6: memref<1x128xf32, #tpu.memory_space<vmem>>, %arg7: memref<1x128xf32, #tpu.memory_space<vmem>>, %arg8: memref<128x128xf32, #tpu.memory_space<vmem>>, %arg9: memref<1x128xf32, #tpu.memory_space<vmem>>, %arg10: memref<8x128xf32, #tpu.memory_space<vmem>>, %arg11: memref<8x8x128xf32, #tpu.memory_space<vmem>>, %arg12: memref<2x8x128xf32, #tpu.memory_space<vmem>>) attributes {dimension_semantics = [#tpu.dimension_semantics<arbitrary>], iteration_bounds = array<i64: 1>, scalar_prefetch = 0 : i64, scratch_operands = 2 : i64, tpu.core_type = #tpu.core_type<tc>, window_params = [{transform_indices = @transform_0, window_bounds = array<i64: 8, 8, 128>}, {pipeline_mode = #tpu.pipeline_mode<synchronous>, transform_indices = @transform_1, window_bounds = array<i64: 128, 128>}, {pipeline_mode = #tpu.pipeline_mode<synchronous>, transform_indices = @transform_2, window_bounds = array<i64: 128, 128>}, {pipeline_mode = #tpu.pipeline_mode<synchronous>, transform_indices = @transform_3, window_bounds = array<i64: 128, 128>}, {pipeline_mode = #tpu.pipeline_mode<synchronous>, transform_indices = @transform_4, window_bounds = array<i64: 128, 128>}, {pipeline_mode = #tpu.pipeline_mode<synchronous>, transform_indices = @transform_5, window_bounds = array<i64: 1, 128>}, {pipeline_mode = #tpu.pipeline_mode<synchronous>, transform_indices = @transform_6, window_bounds = array<i64: 1, 128>}, {pipeline_mode = #tpu.pipeline_mode<synchronous>, transform_indices = @transform_7, window_bounds = array<i64: 128, 128>}, {pipeline_mode = #tpu.pipeline_mode<synchronous>, transform_indices = @transform_8, window_bounds = array<i64: 1, 128>}, {pipeline_mode = #tpu.pipeline_mode<synchronous>, transform_indices = @transform_9, window_bounds = array<i64: 8, 128>}]} {
    %c0_i32 = arith.constant 0 : i32
    %0 = arith.cmpi eq, %arg0, %c0_i32 : i32
    %1 = arith.extui %0 : i1 to i32
    %c0_i32_0 = arith.constant 0 : i32
    %2 = arith.cmpi ne, %1, %c0_i32_0 : i32
    scf.if %2 {
      %cst_112 = arith.constant 0.000000e+00 : f32
      %164 = vector.broadcast %cst_112 : f32 to vector<2x8x128xf32>
      %c0_113 = arith.constant 0 : index
      %c0_114 = arith.constant 0 : index
      %c0_115 = arith.constant 0 : index
      %165 = vector.load %arg12[%c0_113, %c0_114, %c0_115] : memref<2x8x128xf32, #tpu.memory_space<vmem>>, vector<2x8x128xf32>
      tpu.vector_store %arg12[%c0_113, %c0_114, %c0_115], %164 {strides = array<i32>} : memref<2x8x128xf32, #tpu.memory_space<vmem>>, vector<2x8x128xf32>,
    } else {
    }
    %c0 = arith.constant 0 : index
    %c0_1 = arith.constant 0 : index
    %c0_2 = arith.constant 0 : index
    %3 = vector.load %arg1[%c0, %c0_1, %c0_2] : memref<8x8x128xf32, #tpu.memory_space<vmem>>, vector<8x8x128xf32>
    %4 = vector.shape_cast %3 : vector<8x8x128xf32> to vector<64x128xf32>
    %c0_3 = arith.constant 0 : index
    %c0_4 = arith.constant 0 : index
    %5 = vector.load %arg2[%c0_3, %c0_4] : memref<128x128xf32, #tpu.memory_space<vmem>>, vector<128x128xf32>
    %cst = arith.constant dense<0.000000e+00> : vector<64x128xf32>
    %6 = tpu.matmul %4, %5, %cst {dimension_numbers = #tpu.dot_dimension_numbers<[1], [0], [0], [1], [0, 0, 1, 1], [], []>} : vector<64x128xf32>, vector<128x128xf32>, vector<64x128xf32> -> vector<64x128xf32>
    %c0_5 = arith.constant 0 : index
    %c0_6 = arith.constant 0 : index
    %7 = vector.load %arg6[%c0_5, %c0_6] : memref<1x128xf32, #tpu.memory_space<vmem>>, vector<1x128xf32>
    %8 = vector.broadcast %7 : vector<1x128xf32> to vector<64x128xf32>
    %9 = arith.addf %6, %8 : vector<64x128xf32>
    %10 = vector.shape_cast %9 : vector<64x128xf32> to vector<8x8x128xf32>
    %c0_7 = arith.constant 0 : index
    %c0_8 = arith.constant 0 : index
    %c0_9 = arith.constant 0 : index
    %11 = vector.load %arg11[%c0_7, %c0_8, %c0_9] : memref<8x8x128xf32, #tpu.memory_space<vmem>>, vector<8x8x128xf32>
    tpu.vector_store %arg11[%c0_7, %c0_8, %c0_9], %10 {strides = array<i32>} : memref<8x8x128xf32, #tpu.memory_space<vmem>>, vector<8x8x128xf32>,
    %c0_10 = arith.constant 0 : index
    %c0_11 = arith.constant 0 : index
    %12 = vector.load %arg4[%c0_10, %c0_11] : memref<128x128xf32, #tpu.memory_space<vmem>>, vector<128x128xf32>
    %c0_12 = arith.constant 0 : index
    %c0_13 = arith.constant 0 : index
    %c0_14 = arith.constant 0 : index
    %13 = vector.load %arg12[%c0_12, %c0_13, %c0_14] : memref<2x8x128xf32, #tpu.memory_space<vmem>>, vector<1x8x128xf32>
    %14 = vector.shape_cast %13 : vector<1x8x128xf32> to vector<8x128xf32>
    %c0_i32_15 = arith.constant 0 : i32
    %15 = arith.index_cast %c0_i32_15 : i32 to index
    %c0_16 = arith.constant 0 : index
    %c0_17 = arith.constant 0 : index
    %16 = vector.load %arg11[%15, %c0_16, %c0_17] : memref<8x8x128xf32, #tpu.memory_space<vmem>>, vector<1x8x128xf32>
    %17 = vector.shape_cast %16 : vector<1x8x128xf32> to vector<8x128xf32>
    %cst_18 = arith.constant dense<0.000000e+00> : vector<8x128xf32>
    %18 = tpu.matmul %14, %12, %cst_18 {dimension_numbers = #tpu.dot_dimension_numbers<[1], [0], [0], [1], [0, 0, 1, 1], [], []>} : vector<8x128xf32>, vector<128x128xf32>, vector<8x128xf32> -> vector<8x128xf32>
    %19 = arith.addf %17, %18 : vector<8x128xf32>
    %20 = math.tanh %19 : vector<8x128xf32>
    %21 = arith.index_cast %c0_i32_15 : i32 to index
    %c0_19 = arith.constant 0 : index
    %c0_20 = arith.constant 0 : index
    %22 = vector.load %arg11[%21, %c0_19, %c0_20] : memref<8x8x128xf32, #tpu.memory_space<vmem>>, vector<1x8x128xf32>
    %23 = vector.shape_cast %22 : vector<1x8x128xf32> to vector<8x128xf32>
    %24 = vector.shape_cast %20 : vector<8x128xf32> to vector<1x8x128xf32>
    tpu.vector_store %arg11[%21, %c0_19, %c0_20], %24 {strides = array<i32>} : memref<8x8x128xf32, #tpu.memory_space<vmem>>, vector<1x8x128xf32>,
    %c1_i32 = arith.constant 1 : i32
    %25 = arith.index_cast %c1_i32 : i32 to index
    %c0_21 = arith.constant 0 : index
    %c0_22 = arith.constant 0 : index
    %26 = vector.load %arg11[%25, %c0_21, %c0_22] : memref<8x8x128xf32, #tpu.memory_space<vmem>>, vector<1x8x128xf32>
    %27 = vector.shape_cast %26 : vector<1x8x128xf32> to vector<8x128xf32>
    %cst_23 = arith.constant dense<0.000000e+00> : vector<8x128xf32>
    %28 = tpu.matmul %20, %12, %cst_23 {dimension_numbers = #tpu.dot_dimension_numbers<[1], [0], [0], [1], [0, 0, 1, 1], [], []>} : vector<8x128xf32>, vector<128x128xf32>, vector<8x128xf32> -> vector<8x128xf32>
    %29 = arith.addf %27, %28 : vector<8x128xf32>
    %30 = math.tanh %29 : vector<8x128xf32>
    %31 = arith.index_cast %c1_i32 : i32 to index
    %c0_24 = arith.constant 0 : index
    %c0_25 = arith.constant 0 : index
    %32 = vector.load %arg11[%31, %c0_24, %c0_25] : memref<8x8x128xf32, #tpu.memory_space<vmem>>, vector<1x8x128xf32>
    %33 = vector.shape_cast %32 : vector<1x8x128xf32> to vector<8x128xf32>
    %34 = vector.shape_cast %30 : vector<8x128xf32> to vector<1x8x128xf32>
    tpu.vector_store %arg11[%31, %c0_24, %c0_25], %34 {strides = array<i32>} : memref<8x8x128xf32, #tpu.memory_space<vmem>>, vector<1x8x128xf32>,
    %c2_i32 = arith.constant 2 : i32
    %35 = arith.index_cast %c2_i32 : i32 to index
    %c0_26 = arith.constant 0 : index
    %c0_27 = arith.constant 0 : index
    %36 = vector.load %arg11[%35, %c0_26, %c0_27] : memref<8x8x128xf32, #tpu.memory_space<vmem>>, vector<1x8x128xf32>
    %37 = vector.shape_cast %36 : vector<1x8x128xf32> to vector<8x128xf32>
    %cst_28 = arith.constant dense<0.000000e+00> : vector<8x128xf32>
    %38 = tpu.matmul %30, %12, %cst_28 {dimension_numbers = #tpu.dot_dimension_numbers<[1], [0], [0], [1], [0, 0, 1, 1], [], []>} : vector<8x128xf32>, vector<128x128xf32>, vector<8x128xf32> -> vector<8x128xf32>
    %39 = arith.addf %37, %38 : vector<8x128xf32>
    %40 = math.tanh %39 : vector<8x128xf32>
    %41 = arith.index_cast %c2_i32 : i32 to index
    %c0_29 = arith.constant 0 : index
    %c0_30 = arith.constant 0 : index
    %42 = vector.load %arg11[%41, %c0_29, %c0_30] : memref<8x8x128xf32, #tpu.memory_space<vmem>>, vector<1x8x128xf32>
    %43 = vector.shape_cast %42 : vector<1x8x128xf32> to vector<8x128xf32>
    %44 = vector.shape_cast %40 : vector<8x128xf32> to vector<1x8x128xf32>
    tpu.vector_store %arg11[%41, %c0_29, %c0_30], %44 {strides = array<i32>} : memref<8x8x128xf32, #tpu.memory_space<vmem>>, vector<1x8x128xf32>,
    %c3_i32 = arith.constant 3 : i32
    %45 = arith.index_cast %c3_i32 : i32 to index
    %c0_31 = arith.constant 0 : index
    %c0_32 = arith.constant 0 : index
    %46 = vector.load %arg11[%45, %c0_31, %c0_32] : memref<8x8x128xf32, #tpu.memory_space<vmem>>, vector<1x8x128xf32>
    %47 = vector.shape_cast %46 : vector<1x8x128xf32> to vector<8x128xf32>
    %cst_33 = arith.constant dense<0.000000e+00> : vector<8x128xf32>
    %48 = tpu.matmul %40, %12, %cst_33 {dimension_numbers = #tpu.dot_dimension_numbers<[1], [0], [0], [1], [0, 0, 1, 1], [], []>} : vector<8x128xf32>, vector<128x128xf32>, vector<8x128xf32> -> vector<8x128xf32>
    %49 = arith.addf %47, %48 : vector<8x128xf32>
    %50 = math.tanh %49 : vector<8x128xf32>
    %51 = arith.index_cast %c3_i32 : i32 to index
    %c0_34 = arith.constant 0 : index
    %c0_35 = arith.constant 0 : index
    %52 = vector.load %arg11[%51, %c0_34, %c0_35] : memref<8x8x128xf32, #tpu.memory_space<vmem>>, vector<1x8x128xf32>
    %53 = vector.shape_cast %52 : vector<1x8x128xf32> to vector<8x128xf32>
    %54 = vector.shape_cast %50 : vector<8x128xf32> to vector<1x8x128xf32>
    tpu.vector_store %arg11[%51, %c0_34, %c0_35], %54 {strides = array<i32>} : memref<8x8x128xf32, #tpu.memory_space<vmem>>, vector<1x8x128xf32>,
    %c4_i32 = arith.constant 4 : i32
    %55 = arith.index_cast %c4_i32 : i32 to index
    %c0_36 = arith.constant 0 : index
    %c0_37 = arith.constant 0 : index
    %56 = vector.load %arg11[%55, %c0_36, %c0_37] : memref<8x8x128xf32, #tpu.memory_space<vmem>>, vector<1x8x128xf32>
    %57 = vector.shape_cast %56 : vector<1x8x128xf32> to vector<8x128xf32>
    %cst_38 = arith.constant dense<0.000000e+00> : vector<8x128xf32>
    %58 = tpu.matmul %50, %12, %cst_38 {dimension_numbers = #tpu.dot_dimension_numbers<[1], [0], [0], [1], [0, 0, 1, 1], [], []>} : vector<8x128xf32>, vector<128x128xf32>, vector<8x128xf32> -> vector<8x128xf32>
    %59 = arith.addf %57, %58 : vector<8x128xf32>
    %60 = math.tanh %59 : vector<8x128xf32>
    %61 = arith.index_cast %c4_i32 : i32 to index
    %c0_39 = arith.constant 0 : index
    %c0_40 = arith.constant 0 : index
    %62 = vector.load %arg11[%61, %c0_39, %c0_40] : memref<8x8x128xf32, #tpu.memory_space<vmem>>, vector<1x8x128xf32>
    %63 = vector.shape_cast %62 : vector<1x8x128xf32> to vector<8x128xf32>
    %64 = vector.shape_cast %60 : vector<8x128xf32> to vector<1x8x128xf32>
    tpu.vector_store %arg11[%61, %c0_39, %c0_40], %64 {strides = array<i32>} : memref<8x8x128xf32, #tpu.memory_space<vmem>>, vector<1x8x128xf32>,
    %c5_i32 = arith.constant 5 : i32
    %65 = arith.index_cast %c5_i32 : i32 to index
    %c0_41 = arith.constant 0 : index
    %c0_42 = arith.constant 0 : index
    %66 = vector.load %arg11[%65, %c0_41, %c0_42] : memref<8x8x128xf32, #tpu.memory_space<vmem>>, vector<1x8x128xf32>
    %67 = vector.shape_cast %66 : vector<1x8x128xf32> to vector<8x128xf32>
    %cst_43 = arith.constant dense<0.000000e+00> : vector<8x128xf32>
    %68 = tpu.matmul %60, %12, %cst_43 {dimension_numbers = #tpu.dot_dimension_numbers<[1], [0], [0], [1], [0, 0, 1, 1], [], []>} : vector<8x128xf32>, vector<128x128xf32>, vector<8x128xf32> -> vector<8x128xf32>
    %69 = arith.addf %67, %68 : vector<8x128xf32>
    %70 = math.tanh %69 : vector<8x128xf32>
    %71 = arith.index_cast %c5_i32 : i32 to index
    %c0_44 = arith.constant 0 : index
    %c0_45 = arith.constant 0 : index
    %72 = vector.load %arg11[%71, %c0_44, %c0_45] : memref<8x8x128xf32, #tpu.memory_space<vmem>>, vector<1x8x128xf32>
    %73 = vector.shape_cast %72 : vector<1x8x128xf32> to vector<8x128xf32>
    %74 = vector.shape_cast %70 : vector<8x128xf32> to vector<1x8x128xf32>
    tpu.vector_store %arg11[%71, %c0_44, %c0_45], %74 {strides = array<i32>} : memref<8x8x128xf32, #tpu.memory_space<vmem>>, vector<1x8x128xf32>,
    %c6_i32 = arith.constant 6 : i32
    %75 = arith.index_cast %c6_i32 : i32 to index
    %c0_46 = arith.constant 0 : index
    %c0_47 = arith.constant 0 : index
    %76 = vector.load %arg11[%75, %c0_46, %c0_47] : memref<8x8x128xf32, #tpu.memory_space<vmem>>, vector<1x8x128xf32>
    %77 = vector.shape_cast %76 : vector<1x8x128xf32> to vector<8x128xf32>
    %cst_48 = arith.constant dense<0.000000e+00> : vector<8x128xf32>
    %78 = tpu.matmul %70, %12, %cst_48 {dimension_numbers = #tpu.dot_dimension_numbers<[1], [0], [0], [1], [0, 0, 1, 1], [], []>} : vector<8x128xf32>, vector<128x128xf32>, vector<8x128xf32> -> vector<8x128xf32>
    %79 = arith.addf %77, %78 : vector<8x128xf32>
    %80 = math.tanh %79 : vector<8x128xf32>
    %81 = arith.index_cast %c6_i32 : i32 to index
    %c0_49 = arith.constant 0 : index
    %c0_50 = arith.constant 0 : index
    %82 = vector.load %arg11[%81, %c0_49, %c0_50] : memref<8x8x128xf32, #tpu.memory_space<vmem>>, vector<1x8x128xf32>
    %83 = vector.shape_cast %82 : vector<1x8x128xf32> to vector<8x128xf32>
    %84 = vector.shape_cast %80 : vector<8x128xf32> to vector<1x8x128xf32>
    tpu.vector_store %arg11[%81, %c0_49, %c0_50], %84 {strides = array<i32>} : memref<8x8x128xf32, #tpu.memory_space<vmem>>, vector<1x8x128xf32>,
    %c7_i32 = arith.constant 7 : i32
    %85 = arith.index_cast %c7_i32 : i32 to index
    %c0_51 = arith.constant 0 : index
    %c0_52 = arith.constant 0 : index
    %86 = vector.load %arg11[%85, %c0_51, %c0_52] : memref<8x8x128xf32, #tpu.memory_space<vmem>>, vector<1x8x128xf32>
    %87 = vector.shape_cast %86 : vector<1x8x128xf32> to vector<8x128xf32>
    %cst_53 = arith.constant dense<0.000000e+00> : vector<8x128xf32>
    %88 = tpu.matmul %80, %12, %cst_53 {dimension_numbers = #tpu.dot_dimension_numbers<[1], [0], [0], [1], [0, 0, 1, 1], [], []>} : vector<8x128xf32>, vector<128x128xf32>, vector<8x128xf32> -> vector<8x128xf32>
    %89 = arith.addf %87, %88 : vector<8x128xf32>
    %90 = math.tanh %89 : vector<8x128xf32>
    %91 = arith.index_cast %c7_i32 : i32 to index
    %c0_54 = arith.constant 0 : index
    %c0_55 = arith.constant 0 : index
    %92 = vector.load %arg11[%91, %c0_54, %c0_55] : memref<8x8x128xf32, #tpu.memory_space<vmem>>, vector<1x8x128xf32>
    %93 = vector.shape_cast %92 : vector<1x8x128xf32> to vector<8x128xf32>
    %94 = vector.shape_cast %90 : vector<8x128xf32> to vector<1x8x128xf32>
    tpu.vector_store %arg11[%91, %c0_54, %c0_55], %94 {strides = array<i32>} : memref<8x8x128xf32, #tpu.memory_space<vmem>>, vector<1x8x128xf32>,
    %c8_i32 = arith.constant 8 : i32
    %c0_56 = arith.constant 0 : index
    %c0_57 = arith.constant 0 : index
    %c0_58 = arith.constant 0 : index
    %95 = vector.load %arg12[%c0_56, %c0_57, %c0_58] : memref<2x8x128xf32, #tpu.memory_space<vmem>>, vector<1x8x128xf32>
    %96 = vector.shape_cast %95 : vector<1x8x128xf32> to vector<8x128xf32>
    %97 = vector.shape_cast %90 : vector<8x128xf32> to vector<1x8x128xf32>
    tpu.vector_store %arg12[%c0_56, %c0_57, %c0_58], %97 {strides = array<i32>} : memref<2x8x128xf32, #tpu.memory_space<vmem>>, vector<1x8x128xf32>,
    %c0_59 = arith.constant 0 : index
    %c0_60 = arith.constant 0 : index
    %c0_61 = arith.constant 0 : index
    %98 = vector.load %arg11[%c0_59, %c0_60, %c0_61] : memref<8x8x128xf32, #tpu.memory_space<vmem>>, vector<8x8x128xf32>
    %99 = vector.shape_cast %98 : vector<8x8x128xf32> to vector<64x128xf32>
    %c0_62 = arith.constant 0 : index
    %c0_63 = arith.constant 0 : index
    %100 = vector.load %arg3[%c0_62, %c0_63] : memref<128x128xf32, #tpu.memory_space<vmem>>, vector<128x128xf32>
    %cst_64 = arith.constant dense<0.000000e+00> : vector<64x128xf32>
    %101 = tpu.matmul %99, %100, %cst_64 {dimension_numbers = #tpu.dot_dimension_numbers<[1], [0], [0], [1], [0, 0, 1, 1], [], []>} : vector<64x128xf32>, vector<128x128xf32>, vector<64x128xf32> -> vector<64x128xf32>
    %c0_65 = arith.constant 0 : index
    %c0_66 = arith.constant 0 : index
    %102 = vector.load %arg7[%c0_65, %c0_66] : memref<1x128xf32, #tpu.memory_space<vmem>>, vector<1x128xf32>
    %103 = vector.broadcast %102 : vector<1x128xf32> to vector<64x128xf32>
    %104 = arith.addf %101, %103 : vector<64x128xf32>
    %105 = vector.shape_cast %104 : vector<64x128xf32> to vector<8x8x128xf32>
    %c0_67 = arith.constant 0 : index
    %c0_68 = arith.constant 0 : index
    %c0_69 = arith.constant 0 : index
    %106 = vector.load %arg11[%c0_67, %c0_68, %c0_69] : memref<8x8x128xf32, #tpu.memory_space<vmem>>, vector<8x8x128xf32>
    tpu.vector_store %arg11[%c0_67, %c0_68, %c0_69], %105 {strides = array<i32>} : memref<8x8x128xf32, #tpu.memory_space<vmem>>, vector<8x8x128xf32>,
    %c0_70 = arith.constant 0 : index
    %c0_71 = arith.constant 0 : index
    %107 = vector.load %arg5[%c0_70, %c0_71] : memref<128x128xf32, #tpu.memory_space<vmem>>, vector<128x128xf32>
    %c1 = arith.constant 1 : index
    %c0_72 = arith.constant 0 : index
    %c0_73 = arith.constant 0 : index
    %108 = vector.load %arg12[%c1, %c0_72, %c0_73] : memref<2x8x128xf32, #tpu.memory_space<vmem>>, vector<1x8x128xf32>
    %109 = vector.shape_cast %108 : vector<1x8x128xf32> to vector<8x128xf32>
    %c0_i32_74 = arith.constant 0 : i32
    %110 = arith.index_cast %c0_i32_74 : i32 to index
    %c0_75 = arith.constant 0 : index
    %c0_76 = arith.constant 0 : index
    %111 = vector.load %arg11[%110, %c0_75, %c0_76] : memref<8x8x128xf32, #tpu.memory_space<vmem>>, vector<1x8x128xf32>
    %112 = vector.shape_cast %111 : vector<1x8x128xf32> to vector<8x128xf32>
    %cst_77 = arith.constant dense<0.000000e+00> : vector<8x128xf32>
    %113 = tpu.matmul %109, %107, %cst_77 {dimension_numbers = #tpu.dot_dimension_numbers<[1], [0], [0], [1], [0, 0, 1, 1], [], []>} : vector<8x128xf32>, vector<128x128xf32>, vector<8x128xf32> -> vector<8x128xf32>
    %114 = arith.addf %112, %113 : vector<8x128xf32>
    %115 = math.tanh %114 : vector<8x128xf32>
    %c1_i32_78 = arith.constant 1 : i32
    %116 = arith.index_cast %c1_i32_78 : i32 to index
    %c0_79 = arith.constant 0 : index
    %c0_80 = arith.constant 0 : index
    %117 = vector.load %arg11[%116, %c0_79, %c0_80] : memref<8x8x128xf32, #tpu.memory_space<vmem>>, vector<1x8x128xf32>
    %118 = vector.shape_cast %117 : vector<1x8x128xf32> to vector<8x128xf32>
    %cst_81 = arith.constant dense<0.000000e+00> : vector<8x128xf32>
    %119 = tpu.matmul %115, %107, %cst_81 {dimension_numbers = #tpu.dot_dimension_numbers<[1], [0], [0], [1], [0, 0, 1, 1], [], []>} : vector<8x128xf32>, vector<128x128xf32>, vector<8x128xf32> -> vector<8x128xf32>
    %120 = arith.addf %118, %119 : vector<8x128xf32>
    %121 = math.tanh %120 : vector<8x128xf32>
    %c2_i32_82 = arith.constant 2 : i32
    %122 = arith.index_cast %c2_i32_82 : i32 to index
    %c0_83 = arith.constant 0 : index
    %c0_84 = arith.constant 0 : index
    %123 = vector.load %arg11[%122, %c0_83, %c0_84] : memref<8x8x128xf32, #tpu.memory_space<vmem>>, vector<1x8x128xf32>
    %124 = vector.shape_cast %123 : vector<1x8x128xf32> to vector<8x128xf32>
    %cst_85 = arith.constant dense<0.000000e+00> : vector<8x128xf32>
    %125 = tpu.matmul %121, %107, %cst_85 {dimension_numbers = #tpu.dot_dimension_numbers<[1], [0], [0], [1], [0, 0, 1, 1], [], []>} : vector<8x128xf32>, vector<128x128xf32>, vector<8x128xf32> -> vector<8x128xf32>
    %126 = arith.addf %124, %125 : vector<8x128xf32>
    %127 = math.tanh %126 : vector<8x128xf32>
    %c3_i32_86 = arith.constant 3 : i32
    %128 = arith.index_cast %c3_i32_86 : i32 to index
    %c0_87 = arith.constant 0 : index
    %c0_88 = arith.constant 0 : index
    %129 = vector.load %arg11[%128, %c0_87, %c0_88] : memref<8x8x128xf32, #tpu.memory_space<vmem>>, vector<1x8x128xf32>
    %130 = vector.shape_cast %129 : vector<1x8x128xf32> to vector<8x128xf32>
    %cst_89 = arith.constant dense<0.000000e+00> : vector<8x128xf32>
    %131 = tpu.matmul %127, %107, %cst_89 {dimension_numbers = #tpu.dot_dimension_numbers<[1], [0], [0], [1], [0, 0, 1, 1], [], []>} : vector<8x128xf32>, vector<128x128xf32>, vector<8x128xf32> -> vector<8x128xf32>
    %132 = arith.addf %130, %131 : vector<8x128xf32>
    %133 = math.tanh %132 : vector<8x128xf32>
    %c4_i32_90 = arith.constant 4 : i32
    %134 = arith.index_cast %c4_i32_90 : i32 to index
    %c0_91 = arith.constant 0 : index
    %c0_92 = arith.constant 0 : index
    %135 = vector.load %arg11[%134, %c0_91, %c0_92] : memref<8x8x128xf32, #tpu.memory_space<vmem>>, vector<1x8x128xf32>
    %136 = vector.shape_cast %135 : vector<1x8x128xf32> to vector<8x128xf32>
    %cst_93 = arith.constant dense<0.000000e+00> : vector<8x128xf32>
    %137 = tpu.matmul %133, %107, %cst_93 {dimension_numbers = #tpu.dot_dimension_numbers<[1], [0], [0], [1], [0, 0, 1, 1], [], []>} : vector<8x128xf32>, vector<128x128xf32>, vector<8x128xf32> -> vector<8x128xf32>
    %138 = arith.addf %136, %137 : vector<8x128xf32>
    %139 = math.tanh %138 : vector<8x128xf32>
    %c5_i32_94 = arith.constant 5 : i32
    %140 = arith.index_cast %c5_i32_94 : i32 to index
    %c0_95 = arith.constant 0 : index
    %c0_96 = arith.constant 0 : index
    %141 = vector.load %arg11[%140, %c0_95, %c0_96] : memref<8x8x128xf32, #tpu.memory_space<vmem>>, vector<1x8x128xf32>
    %142 = vector.shape_cast %141 : vector<1x8x128xf32> to vector<8x128xf32>
    %cst_97 = arith.constant dense<0.000000e+00> : vector<8x128xf32>
    %143 = tpu.matmul %139, %107, %cst_97 {dimension_numbers = #tpu.dot_dimension_numbers<[1], [0], [0], [1], [0, 0, 1, 1], [], []>} : vector<8x128xf32>, vector<128x128xf32>, vector<8x128xf32> -> vector<8x128xf32>
    %144 = arith.addf %142, %143 : vector<8x128xf32>
    %145 = math.tanh %144 : vector<8x128xf32>
    %c6_i32_98 = arith.constant 6 : i32
    %146 = arith.index_cast %c6_i32_98 : i32 to index
    %c0_99 = arith.constant 0 : index
    %c0_100 = arith.constant 0 : index
    %147 = vector.load %arg11[%146, %c0_99, %c0_100] : memref<8x8x128xf32, #tpu.memory_space<vmem>>, vector<1x8x128xf32>
    %148 = vector.shape_cast %147 : vector<1x8x128xf32> to vector<8x128xf32>
    %cst_101 = arith.constant dense<0.000000e+00> : vector<8x128xf32>
    %149 = tpu.matmul %145, %107, %cst_101 {dimension_numbers = #tpu.dot_dimension_numbers<[1], [0], [0], [1], [0, 0, 1, 1], [], []>} : vector<8x128xf32>, vector<128x128xf32>, vector<8x128xf32> -> vector<8x128xf32>
    %150 = arith.addf %148, %149 : vector<8x128xf32>
    %151 = math.tanh %150 : vector<8x128xf32>
    %c7_i32_102 = arith.constant 7 : i32
    %152 = arith.index_cast %c7_i32_102 : i32 to index
    %c0_103 = arith.constant 0 : index
    %c0_104 = arith.constant 0 : index
    %153 = vector.load %arg11[%152, %c0_103, %c0_104] : memref<8x8x128xf32, #tpu.memory_space<vmem>>, vector<1x8x128xf32>
    %154 = vector.shape_cast %153 : vector<1x8x128xf32> to vector<8x128xf32>
    %cst_105 = arith.constant dense<0.000000e+00> : vector<8x128xf32>
    %155 = tpu.matmul %151, %107, %cst_105 {dimension_numbers = #tpu.dot_dimension_numbers<[1], [0], [0], [1], [0, 0, 1, 1], [], []>} : vector<8x128xf32>, vector<128x128xf32>, vector<8x128xf32> -> vector<8x128xf32>
    %156 = arith.addf %154, %155 : vector<8x128xf32>
    %157 = math.tanh %156 : vector<8x128xf32>
    %c8_i32_106 = arith.constant 8 : i32
    %c1_107 = arith.constant 1 : index
    %c0_108 = arith.constant 0 : index
    %c0_109 = arith.constant 0 : index
    %158 = vector.load %arg12[%c1_107, %c0_108, %c0_109] : memref<2x8x128xf32, #tpu.memory_space<vmem>>, vector<1x8x128xf32>
    %159 = vector.shape_cast %158 : vector<1x8x128xf32> to vector<8x128xf32>
    %160 = vector.shape_cast %157 : vector<8x128xf32> to vector<1x8x128xf32>
    tpu.vector_store %arg12[%c1_107, %c0_108, %c0_109], %160 {strides = array<i32>} : memref<2x8x128xf32, #tpu.memory_space<vmem>>, vector<1x8x128xf32>,
    %c0_i32_110 = arith.constant 0 : i32
    %161 = arith.cmpi eq, %arg0, %c0_i32_110 : i32
    %162 = arith.extui %161 : i1 to i32
    %c0_i32_111 = arith.constant 0 : i32
    %163 = arith.cmpi ne, %162, %c0_i32_111 : i32
    scf.if %163 {
      %c1_112 = arith.constant 1 : index
      %c0_113 = arith.constant 0 : index
      %c0_114 = arith.constant 0 : index
      %164 = vector.load %arg12[%c1_112, %c0_113, %c0_114] : memref<2x8x128xf32, #tpu.memory_space<vmem>>, vector<1x8x128xf32>
      %165 = vector.shape_cast %164 : vector<1x8x128xf32> to vector<8x128xf32>
      %c0_115 = arith.constant 0 : index
      %c0_116 = arith.constant 0 : index
      %166 = vector.load %arg8[%c0_115, %c0_116] : memref<128x128xf32, #tpu.memory_space<vmem>>, vector<128x128xf32>
      %cst_117 = arith.constant dense<0.000000e+00> : vector<8x128xf32>
      %167 = tpu.matmul %165, %166, %cst_117 {dimension_numbers = #tpu.dot_dimension_numbers<[1], [0], [0], [1], [0, 0, 1, 1], [], []>} : vector<8x128xf32>, vector<128x128xf32>, vector<8x128xf32> -> vector<8x128xf32>
      %c0_118 = arith.constant 0 : index
      %c0_119 = arith.constant 0 : index
      %168 = vector.load %arg9[%c0_118, %c0_119] : memref<1x128xf32, #tpu.memory_space<vmem>>, vector<1x128xf32>
      %169 = vector.broadcast %168 : vector<1x128xf32> to vector<8x128xf32>
      %170 = arith.addf %167, %169 : vector<8x128xf32>
      %c0_120 = arith.constant 0 : index
      %c0_121 = arith.constant 0 : index
      %171 = vector.load %arg10[%c0_120, %c0_121] : memref<8x128xf32, #tpu.memory_space<vmem>>, vector<8x128xf32>
      tpu.vector_store %arg10[%c0_120, %c0_121], %170 {strides = array<i32>} : memref<8x128xf32, #tpu.memory_space<vmem>>, vector<8x128xf32>,
    } else {
    }
    return
  }
  func.func @transform_0(%arg0: i32) -> (i32, i32, i32) {
    %c0_i32 = arith.constant 0 : i32
    %c0_i32_0 = arith.constant 0 : i32
    %c0_i32_1 = arith.constant 0 : i32
    return %arg0, %c0_i32, %c0_i32_0 : i32, i32, i32
  }
  func.func @transform_1(%arg0: i32) -> (i32, i32) {
    %c0_i32 = arith.constant 0 : i32
    %c0_i32_0 = arith.constant 0 : i32
    %c0_i32_1 = arith.constant 0 : i32
    return %c0_i32, %c0_i32_0 : i32, i32
  }
  func.func @transform_2(%arg0: i32) -> (i32, i32) {
    %c0_i32 = arith.constant 0 : i32
    %c0_i32_0 = arith.constant 0 : i32
    %c0_i32_1 = arith.constant 0 : i32
    return %c0_i32, %c0_i32_0 : i32, i32
  }
  func.func @transform_3(%arg0: i32) -> (i32, i32) {
    %c0_i32 = arith.constant 0 : i32
    %c0_i32_0 = arith.constant 0 : i32
    %c0_i32_1 = arith.constant 0 : i32
    return %c0_i32, %c0_i32_0 : i32, i32
  }
  func.func @transform_4(%arg0: i32) -> (i32, i32) {
    %c0_i32 = arith.constant 0 : i32
    %c0_i32_0 = arith.constant 0 : i32
    %c0_i32_1 = arith.constant 0 : i32
    return %c0_i32, %c0_i32_0 : i32, i32
  }
  func.func @transform_5(%arg0: i32) -> (i32, i32) {
    %c0_i32 = arith.constant 0 : i32
    %c0_i32_0 = arith.constant 0 : i32
    %c0_i32_1 = arith.constant 0 : i32
    return %c0_i32, %c0_i32_0 : i32, i32
  }
  func.func @transform_6(%arg0: i32) -> (i32, i32) {
    %c0_i32 = arith.constant 0 : i32
    %c0_i32_0 = arith.constant 0 : i32
    %c0_i32_1 = arith.constant 0 : i32
    return %c0_i32, %c0_i32_0 : i32, i32
  }
  func.func @transform_7(%arg0: i32) -> (i32, i32) {
    %c0_i32 = arith.constant 0 : i32
    %c0_i32_0 = arith.constant 0 : i32
    %c0_i32_1 = arith.constant 0 : i32
    return %c0_i32, %c0_i32_0 : i32, i32
  }
  func.func @transform_8(%arg0: i32) -> (i32, i32) {
    %c0_i32 = arith.constant 0 : i32
    %c0_i32_0 = arith.constant 0 : i32
    %c0_i32_1 = arith.constant 0 : i32
    return %c0_i32, %c0_i32_0 : i32, i32
  }
  func.func @transform_9(%arg0: i32) -> (i32, i32) {
    %c0_i32 = arith.constant 0 : i32
    %c0_i32_0 = arith.constant 0 : i32
    %c0_i32_1 = arith.constant 0 : i32
    return %c0_i32, %c0_i32_0 : i32, i32
  }
}

</mosaic_0001>

<bundles_post_ra>
// kernel: rnn_forward.1
= control target key start
LH: loop header
LB: loop body
LE: loop exit
PB: predicated region body
PF: predicated region fallthrough
CT: control target
= control target key end

     0   :  { %v2705_v2 = vmov 0.0   ;;  %vm2706_vm0 = vmmov 0   ;;  %s3731_s1 = inlined_call_operand.vmem [shape: f32[128,128], index: 1, kind: input, shape index: {}]   ;;  %s3732_s3 = inlined_call_operand.vmem [shape: f32[128,128], index: 3, kind: input, shape index: {}]   ;;  %s3733_s0 = inlined_call_operand.vmem [shape: f32[8,8,128], index: 0, kind: input, shape index: {}]   ;;  %s3734_s5 = inlined_call_operand.vmem [shape: f32[1,128], index: 5, kind: input, shape index: {}]   ;;  %s3735_s2 = inlined_call_operand.vmem [shape: f32[128,128], index: 2, kind: input, shape index: {}]   ;;  %s3736_s4 = inlined_call_operand.vmem [shape: f32[128,128], index: 4, kind: input, shape index: {}]   ;;  %s3737_s6 = inlined_call_operand.vmem [shape: f32[1,128], index: 6, kind: input, shape index: {}]   ;;  %s3738_s7 = inlined_call_operand.vmem [shape: f32[128,128], index: 7, kind: input, shape index: {}]   ;;  %s3739_s8 = inlined_call_operand.vmem [shape: f32[1,128], index: 8, kind: input, shape index: {}]   ;;  %s3740_s9 = inlined_call_operand.vmem [shape: f32[8,128], index: 9, kind: output, shape index: {}]  }
   0x1   :  { %v61_v0 = vld [vmem:[%s3731_s1 + $0x78] sm:$0xff]  ;;  %v60_v1 = vld [vmem:[%s3731_s1 + $0x70] sm:$0xff]  ;;  %2032 = vmatprep.subr.mxu1 %v2705_v2  ;;  %2064 = vmatprep.mubr.msk.f32.mxu1 %vm2706_vm0, %v2705_v2  ;;  %v59_v5 = vld [vmem:[%s3731_s1 + $0x68] sm:$0xff] }
   0x2   :  { %v2767_v3 = vld [vmem:[%s3732_s3 + $0x78] sm:$0xff]  ;;  %1988 = vmatprep.subr.mxu0 %v61_v0  ;;  %v2775_v4 = vld [vmem:[%s3732_s3 + $0x70] sm:$0xff]  ;;  %v2784_v6 = vld [vmem:[%s3732_s3 + $0x68] sm:$0xff] }
   0x3   :  { %2033 = vmatpush3.msra.mxu1 %v2767_v3  ;;  %1989 = vmatpush3.msra.mxu0 %v61_v0  ;;  %v58_v7 = vld [vmem:[%s3731_s1 + $0x60] sm:$0xff]  ;;  %v57_v9 = vld [vmem:[%s3731_s1 + $0x58] sm:$0xff]  ;;  %v56_v11 = vld [vmem:[%s3731_s1 + $0x50] sm:$0xff] }
   0x4   :  { %2034 = vmatprep.subr.mxu1 %v2705_v2  ;;  %1990 = vmatprep.subr.mxu0 %v60_v1  ;;  %v2794_v8 = vld [vmem:[%s3732_s3 + $0x60] sm:$0xff]  ;;  %v2804_v10 = vld [vmem:[%s3732_s3 + $0x58] sm:$0xff]  ;;  %v2814_v12 = vld [vmem:[%s3732_s3 + $0x50] sm:$0xff] }
   0x5   :  { %2035 = vmatpush3.msra.mxu1 %v2775_v4  ;;  %1991 = vmatpush3.msra.mxu0 %v60_v1  ;;  %v55_v13 = vld [vmem:[%s3731_s1 + $0x48] sm:$0xff]  ;;  %v54_v15 = vld [vmem:[%s3731_s1 + $0x40] sm:$0xff]  ;;  %v53_v17 = vld [vmem:[%s3731_s1 + $0x38] sm:$0xff] }
   0x6   :  { %2036 = vmatprep.subr.mxu1 %v2705_v2  ;;  %1992 = vmatprep.subr.mxu0 %v59_v5  ;;  %v2824_v14 = vld [vmem:[%s3732_s3 + $0x48] sm:$0xff]  ;;  %v2834_v16 = vld [vmem:[%s3732_s3 + $0x40] sm:$0xff]  ;;  %v2844_v18 = vld [vmem:[%s3732_s3 + $0x38] sm:$0xff] }
   0x7   :  { %2037 = vmatpush3.msra.mxu1 %v2784_v6  ;;  %1993 = vmatpush3.msra.mxu0 %v59_v5  ;;  %v52_v19 = vld [vmem:[%s3731_s1 + $0x30] sm:$0xff]  ;;  %v51_v21 = vld [vmem:[%s3731_s1 + $0x28] sm:$0xff]  ;;  %v50_v23 = vld [vmem:[%s3731_s1 + $0x20] sm:$0xff] }
   0x8   :  { %2038 = vmatprep.subr.mxu1 %v2705_v2  ;;  %1994 = vmatprep.subr.mxu0 %v58_v7  ;;  %v2854_v20 = vld [vmem:[%s3732_s3 + $0x30] sm:$0xff]  ;;  %v2864_v22 = vld [vmem:[%s3732_s3 + $0x28] sm:$0xff]  ;;  %v2874_v24 = vld [vmem:[%s3732_s3 + $0x20] sm:$0xff] }
   0x9   :  { %2039 = vmatpush3.msra.mxu1 %v2794_v8  ;;  %1995 = vmatpush3.msra.mxu0 %v58_v7  ;;  %v49_v25 = vld [vmem:[%s3731_s1 + $0x18] sm:$0xff]  ;;  %v48_v27 = vld [vmem:[%s3731_s1 + $0x10] sm:$0xff]  ;;  %v47_v29 = vld [vmem:[%s3731_s1 + $0x8] sm:$0xff] }
   0xa   :  { %2040 = vmatprep.subr.mxu1 %v2705_v2  ;;  %1996 = vmatprep.subr.mxu0 %v57_v9  ;;  %v2884_v26 = vld [vmem:[%s3732_s3 + $0x18] sm:$0xff]  ;;  %v2894_v28 = vld [vmem:[%s3732_s3 + $0x10] sm:$0xff]  ;;  %v38_v30 = vld [vmem:[%s3733_s0] sm:$0xff] }
   0xb   :  { %2041 = vmatpush3.msra.mxu1 %v2804_v10  ;;  %1997 = vmatpush3.msra.mxu0 %v57_v9  ;;  %v2908_v31 = vld [vmem:[%s3732_s3 + $0x8] sm:$0xff]  ;;  %v46_v32 = vld [vmem:[%s3731_s1] sm:$0xff]  ;;  %v40_v35 = vld [vmem:[%s3733_s0 + $0x10] sm:$0xff] }
   0xc   :  { %2042 = vmatprep.subr.mxu1 %v2705_v2  ;;  %1998 = vmatprep.subr.mxu0 %v56_v11  ;;  %v2917_v33 = vld [vmem:[%s3732_s3] sm:$0xff]  ;;  %v39_v34 = vld [vmem:[%s3733_s0 + $0x8] sm:$0xff]  ;;  %v41_v36 = vld [vmem:[%s3733_s0 + $0x18] sm:$0xff] }
   0xd   :  { %2043 = vmatpush3.msra.mxu1 %v2814_v12  ;;  %1999 = vmatpush3.msra.mxu0 %v56_v11  ;;  %v42_v37 = vld [vmem:[%s3733_s0 + $0x20] sm:$0xff]  ;;  %v43_v38 = vld [vmem:[%s3733_s0 + $0x28] sm:$0xff]  ;;  %v44_v39 = vld [vmem:[%s3733_s0 + $0x30] sm:$0xff] }
   0xe   :  { %2044 = vmatprep.subr.mxu1 %v2705_v2  ;;  %2000 = vmatprep.subr.mxu0 %v55_v13  ;;  %v45_v40 = vld [vmem:[%s3733_s0 + $0x38] sm:$0xff]  ;;  %v3017_v43 = vld [vmem:[%s3734_s5] ss:$0 sm:$0xff] }
   0xf   :  { %2045 = vmatpush3.msra.mxu1 %v2824_v14  ;;  %2001 = vmatpush3.msra.mxu0 %v55_v13 }
  0x10   :  { %2046 = vmatprep.subr.mxu1 %v2705_v2  ;;  %2002 = vmatprep.subr.mxu0 %v54_v15 }
  0x11   :  { %2047 = vmatpush3.msra.mxu1 %v2834_v16  ;;  %2003 = vmatpush3.msra.mxu0 %v54_v15 }
  0x12   :  { %2048 = vmatprep.subr.mxu1 %v2705_v2  ;;  %2004 = vmatprep.subr.mxu0 %v53_v17 }
  0x13   :  { %2049 = vmatpush3.msra.mxu1 %v2844_v18  ;;  %2005 = vmatpush3.msra.mxu0 %v53_v17 }
  0x14   :  { %2050 = vmatprep.subr.mxu1 %v2705_v2  ;;  %2006 = vmatprep.subr.mxu0 %v52_v19 }
  0x15   :  { %2051 = vmatpush3.msra.mxu1 %v2854_v20  ;;  %2007 = vmatpush3.msra.mxu0 %v52_v19 }
  0x16   :  { %2052 = vmatprep.subr.mxu1 %v2705_v2  ;;  %2008 = vmatprep.subr.mxu0 %v51_v21 }
  0x17   :  { %2053 = vmatpush3.msra.mxu1 %v2864_v22  ;;  %2009 = vmatpush3.msra.mxu0 %v51_v21 }
  0x18   :  { %2054 = vmatprep.subr.mxu1 %v2705_v2  ;;  %2010 = vmatprep.subr.mxu0 %v50_v23 }
  0x19   :  { %2055 = vmatpush3.msra.mxu1 %v2874_v24  ;;  %2011 = vmatpush3.msra.mxu0 %v50_v23  ;;  %v816_v23 = vld [vmem:[%s3735_s2 + $0x48] sm:$0xff] }
  0x1a   :  { %2056 = vmatprep.subr.mxu1 %v2705_v2  ;;  %2012 = vmatprep.subr.mxu0 %v49_v25 }
  0x1b   :  { %2057 = vmatpush3.msra.mxu1 %v2884_v26  ;;  %2013 = vmatpush3.msra.mxu0 %v49_v25  ;;  %v814_v25 = vld [vmem:[%s3735_s2 + $0x38] sm:$0xff] }
  0x1c   :  { %2058 = vmatprep.subr.mxu1 %v2705_v2  ;;  %2014 = vmatprep.subr.mxu0 %v48_v27 }
  0x1d   :  { %2059 = vmatpush3.msra.mxu1 %v2894_v28  ;;  %2015 = vmatpush3.msra.mxu0 %v48_v27  ;;  %v812_v27 = vld [vmem:[%s3735_s2 + $0x28] sm:$0xff] }
  0x1e   :  { %2060 = vmatprep.subr.mxu1 %v2705_v2  ;;  %2016 = vmatprep.subr.mxu0 %v47_v29 }
  0x1f   :  { %2020 = vmatprep.mubr.f32.mxu0 %v38_v30  ;;  %2017 = vmatpush3.msra.mxu0 %v47_v29  ;;  %v810_v29 = vld [vmem:[%s3735_s2 + $0x18] sm:$0xff]  ;;  %v809_v30 = vld [vmem:[%s3735_s2 + $0x10] sm:$0xff] }
  0x20   :  { %2061 = vmatpush3.msra.mxu1 %v2908_v31  ;;  %2018 = vmatprep.subr.mxu0 %v46_v32 }
  0x21   :  { %2062 = vmatprep.subr.mxu1 %v2705_v2  ;;  %2019 = vmatpush3.msra.mxu0 %v46_v32  ;;  %v807_v32 = vld [vmem:[%s3735_s2] sm:$0xff] }
  0x22   :  { %2063 = vmatpush3.msra.mxu1 %v2917_v33  ;;  %2021 = vmatmul.mubr.f32.vlgmr.msra.gmra.mxu0 %v39_v34  ;;  %v3285_v34 = vld [vmem:[%s3736_s4 + $0x70] sm:$0xff] }
  0x23   :  { %2065 = vmatmul.mubr.f32.vlgmr.msra.gmra.mxu1 %v2705_v2  ;;  %2067 = vmatprep.subr.mxu0 %v2705_v2 }
  0x24   :  { %2102 = vmatprep.subr.mxu1 %v2705_v2  ;;  %2068 = vmatpush3.msra.mxu0 %v2767_v3 }
  0x25   :  { %2103 = vmatpush3.msra.mxu1 %v2767_v3  ;;  %2069 = vmatprep.subr.mxu0 %v2705_v2 }
  0x26   :  { %2104 = vmatprep.subr.mxu1 %v2705_v2  ;;  %2070 = vmatpush3.msra.mxu0 %v2775_v4 }
  0x27   :  { %2105 = vmatpush3.msra.mxu1 %v2775_v4  ;;  %2071 = vmatprep.subr.mxu0 %v2705_v2 }
  0x28   :  { %2106 = vmatprep.subr.mxu1 %v2705_v2  ;;  %2072 = vmatpush3.msra.mxu0 %v2784_v6 }
  0x29   :  { %2107 = vmatpush3.msra.mxu1 %v2784_v6  ;;  %2073 = vmatprep.subr.mxu0 %v2705_v2 }
  0x2a   :  { %2108 = vmatprep.subr.mxu1 %v2705_v2  ;;  %2074 = vmatpush3.msra.mxu0 %v2794_v8 }
  0x2b   :  { %2109 = vmatpush3.msra.mxu1 %v2794_v8  ;;  %2075 = vmatprep.subr.mxu0 %v2705_v2 }
  0x2c   :  { %2110 = vmatprep.subr.mxu1 %v2705_v2  ;;  %2076 = vmatpush3.msra.mxu0 %v2804_v10 }
  0x2d   :  { %2111 = vmatpush3.msra.mxu1 %v2804_v10  ;;  %2077 = vmatprep.subr.mxu0 %v2705_v2 }
  0x2e   :  { %2112 = vmatprep.subr.mxu1 %v2705_v2  ;;  %2078 = vmatpush3.msra.mxu0 %v2814_v12 }
  0x2f   :  { %2113 = vmatpush3.msra.mxu1 %v2814_v12  ;;  %2079 = vmatprep.subr.mxu0 %v2705_v2 }
  0x30   :  { %2114 = vmatprep.subr.mxu1 %v2705_v2  ;;  %2080 = vmatpush3.msra.mxu0 %v2824_v14 }
  0x31   :  { %2115 = vmatpush3.msra.mxu1 %v2824_v14  ;;  %2081 = vmatprep.subr.mxu0 %v2705_v2 }
  0x32   :  { %2116 = vmatprep.subr.mxu1 %v2705_v2  ;;  %2082 = vmatpush3.msra.mxu0 %v2834_v16 }
  0x33   :  { %2117 = vmatpush3.msra.mxu1 %v2834_v16  ;;  %2083 = vmatprep.subr.mxu0 %v2705_v2 }
  0x34   :  { %2118 = vmatprep.subr.mxu1 %v2705_v2  ;;  %2084 = vmatpush3.msra.mxu0 %v2844_v18 }
  0x35   :  { %2119 = vmatpush3.msra.mxu1 %v2844_v18  ;;  %2085 = vmatprep.subr.mxu0 %v2705_v2 }
  0x36   :  { %2120 = vmatprep.subr.mxu1 %v2705_v2  ;;  %2086 = vmatpush3.msra.mxu0 %v2854_v20 }
  0x37   :  { %2121 = vmatpush3.msra.mxu1 %v2854_v20  ;;  %2087 = vmatprep.subr.mxu0 %v2705_v2 }
  0x38   :  { %2122 = vmatprep.subr.mxu1 %v2705_v2  ;;  %2088 = vmatpush3.msra.mxu0 %v2864_v22 }
  0x39   :  { %2123 = vmatpush3.msra.mxu1 %v2864_v22  ;;  %2089 = vmatprep.subr.mxu0 %v2705_v2 }
  0x3a   :  { %2124 = vmatprep.subr.mxu1 %v2705_v2  ;;  %2090 = vmatpush3.msra.mxu0 %v2874_v24 }
  0x3b   :  { %2125 = vmatpush3.msra.mxu1 %v2874_v24  ;;  %2091 = vmatprep.subr.mxu0 %v2705_v2 }
  0x3c   :  { %2126 = vmatprep.subr.mxu1 %v2705_v2  ;;  %2092 = vmatpush3.msra.mxu0 %v2884_v26 }
  0x3d   :  { %2127 = vmatpush3.msra.mxu1 %v2884_v26  ;;  %2093 = vmatprep.subr.mxu0 %v2705_v2 }
  0x3e   :  { %2128 = vmatprep.subr.mxu1 %v2705_v2  ;;  %2094 = vmatpush3.msra.mxu0 %v2894_v28 }
  0x3f   :  { %2129 = vmatpush3.msra.mxu1 %v2894_v28  ;;  %2095 = vmatprep.subr.mxu0 %v2705_v2 }
  0x40   :  { %2130 = vmatprep.subr.mxu1 %v2705_v2  ;;  %2096 = vmatpush3.msra.mxu0 %v2908_v31 }
  0x41   :  { %2131 = vmatpush3.msra.mxu1 %v2908_v31  ;;  %2097 = vmatprep.subr.mxu0 %v2705_v2 }
  0x42   :  { %2132 = vmatprep.subr.mxu1 %v2705_v2  ;;  %2098 = vmatpush3.msra.mxu0 %v2917_v33 }
  0x43   :  { %2133 = vmatpush3.msra.mxu1 %v2917_v33  ;;  %2134 = vmatprep.mubr.msk.f32.mxu1 %vm2706_vm0, %v2705_v2 }
  0x44   :  { %2137 = vmatprep.subr.mxu0 %v2705_v2  ;;  %2172 = vmatprep.subr.mxu1 %v2705_v2 }
  0x45   :  { %2023 = vmatprep.mubr.f32.mxu0 %v40_v35  ;;  %v3292_v35 = vld [vmem:[%s3736_s4 + $0x68] sm:$0xff] }
  0x46   :  { %2024 = vmatmul.mubr.f32.gmra.mxu0 %v41_v36  ;;  %v3299_v36 = vld [vmem:[%s3736_s4 + $0x60] sm:$0xff] }
  0x47   :  { %2026 = vmatprep.mubr.f32.mxu0 %v42_v37  ;;  %v3306_v37 = vld [vmem:[%s3736_s4 + $0x58] sm:$0xff] }
  0x4a   :  { %2027 = vmatmul.mubr.f32.gmra.mxu0 %v43_v38  ;;  %v3313_v38 = vld [vmem:[%s3736_s4 + $0x50] sm:$0xff] }
  0x4b   :  { %2029 = vmatprep.mubr.f32.mxu0 %v44_v39  ;;  %v3320_v39 = vld [vmem:[%s3736_s4 + $0x48] sm:$0xff] }
  0x4e   :  { %2030 = vmatmul.mubr.f32.gmra.mxu0 %v45_v40  ;;  %v3327_v40 = vld [vmem:[%s3736_s4 + $0x40] sm:$0xff] }
  0x4f   :  { %2099 = vmatprep.mubr.msk.f32.mxu0 %vm2706_vm0, %v2705_v2 }
  0xe2   :  { %v2022_v41 = vpop.f32.mrf.mxu0 }
  0xe3   :  { %v266_v42 = vpop.f32.mrf.mxu1  ;;  %v141_v55 = vadd.f32 %v2022_v41, %v3017_v43  ;;  %v3334_v41 = vld [vmem:[%s3736_s4 + $0x38] sm:$0xff] }
  0xe4   :  { %v135_v44 = vpop.f32.mrf.mxu0 }
  0xe5   :  { %v2066_v45 = vpop.f32.mrf.mxu1  ;;  %v136_v46 = vadd.f32 %v3017_v43, %v135_v44  ;;  %v3348_v44 = vld [vmem:[%s3736_s4 + $0x28] sm:$0xff] }
  0xe6   :  { %v3355_v45 = vld [vmem:[%s3736_s4 + $0x20] sm:$0xff] }
  0xe7   :  { %v270_v47 = vadd.f32 %v266_v42, %v136_v46  ;;  %v3341_v42 = vld [vmem:[%s3736_s4 + $0x30] sm:$0xff]  ;;  %v3362_v46 = vld [vmem:[%s3736_s4 + $0x18] sm:$0xff] }
  0xe9   :  { %2673 = vtanh.f32 %v270_v47  ;;  %v3369_v47 = vld [vmem:[%s3736_s4 + $0x10] sm:$0xff] }
  0xf6   :  { %v3020_v48 = vpop.eup %2673 }
  0xf7   :  { %2100 = vmatmul.mubr.f32.vlgmr.msra.gmra.mxu0 %v3020_v48 }
  0xf8   :  { %2138 = vmatpush3.msra.mxu0 %v2767_v3  ;;  %2169 = vmatprep.mubr.msk.f32.mxu0 %vm2706_vm0, %v2705_v2 }
  0xf9   :  { %2139 = vmatprep.subr.mxu0 %v2705_v2 }
  0xfa   :  { %2140 = vmatpush3.msra.mxu0 %v2775_v4 }
  0xfb   :  { %2141 = vmatprep.subr.mxu0 %v2705_v2 }
  0xfc   :  { %2142 = vmatpush3.msra.mxu0 %v2784_v6 }
  0xfd   :  { %2143 = vmatprep.subr.mxu0 %v2705_v2 }
  0xfe   :  { %2144 = vmatpush3.msra.mxu0 %v2794_v8 }
  0xff   :  { %2145 = vmatprep.subr.mxu0 %v2705_v2 }
 0x100   :  { %2146 = vmatpush3.msra.mxu0 %v2804_v10 }
 0x101   :  { %2147 = vmatprep.subr.mxu0 %v2705_v2 }
 0x102   :  { %2148 = vmatpush3.msra.mxu0 %v2814_v12 }
 0x103   :  { %2149 = vmatprep.subr.mxu0 %v2705_v2 }
 0x104   :  { %2150 = vmatpush3.msra.mxu0 %v2824_v14 }
 0x105   :  { %2151 = vmatprep.subr.mxu0 %v2705_v2 }
 0x106   :  { %2152 = vmatpush3.msra.mxu0 %v2834_v16  ;;  %v3057_v49 = vpop.f32.mrf.mxu0 }
 0x107   :  { %2153 = vmatprep.subr.mxu0 %v2705_v2  ;;  %v151_v1 = vadd.f32 %v3057_v49, %v3017_v43  ;;  %v3383_v49 = vld [vmem:[%s3736_s4] sm:$0xff] }
 0x108   :  { %2154 = vmatpush3.msra.mxu0 %v2844_v18  ;;  %v145_v50 = vpop.f32.mrf.mxu0 }
 0x109   :  { %2155 = vmatprep.subr.mxu0 %v2705_v2  ;;  %v146_v60 = vadd.f32 %v3017_v43, %v145_v50 }
 0x10a   :  { %2156 = vmatpush3.msra.mxu0 %v2854_v20  ;;  %v3059_v51 = vpop.f32.mrf.mxu0 }
 0x10b   :  { %2157 = vmatprep.subr.mxu0 %v2705_v2 }
 0x10c   :  { %2158 = vmatpush3.msra.mxu0 %v2864_v22  ;;  %v3061_v52 = vpop.f32.mrf.mxu0 }
 0x10d   :  { %2159 = vmatprep.subr.mxu0 %v2705_v2  ;;  %v156_v13 = vadd.f32 %v3017_v43, %v3061_v52 }
 0x10e   :  { %2160 = vmatpush3.msra.mxu0 %v2874_v24  ;;  %v3063_v53 = vpop.f32.mrf.mxu0 }
 0x10f   :  { %2161 = vmatprep.subr.mxu0 %v2705_v2 }
 0x110   :  { %2162 = vmatpush3.msra.mxu0 %v2884_v26  ;;  %v3065_v54 = vpop.f32.mrf.mxu0 }
 0x111   :  { %2163 = vmatprep.subr.mxu0 %v2705_v2  ;;  %v166_v50 = vadd.f32 %v3017_v43, %v3065_v54  ;;  %v171_v54 = vadd.f32 %v3063_v53, %v3017_v43 }
 0x112   :  { %2164 = vmatpush3.msra.mxu0 %v2894_v28 }
 0x113   :  { %2165 = vmatprep.subr.mxu0 %v2705_v2 }
 0x114   :  { %2166 = vmatpush3.msra.mxu0 %v2908_v31 }
 0x115   :  { %2167 = vmatprep.subr.mxu0 %v2705_v2 }
 0x116   :  { %2168 = vmatpush3.msra.mxu0 %v2917_v33 }
 0x117   :  { %2207 = vmatprep.subr.mxu0 %v2705_v2 }
 0x1b7   :  { %v341_v56 = vpop.f32.mrf.mxu0 }
 0x1b8   :  { %v345_v57 = vadd.f32 %v341_v56, %v141_v55 }
 0x1b9   :  { %v2101_v58 = vpop.f32.mrf.mxu0 }
 0x1ba   :  { %2675 = vtanh.f32 %v345_v57 }
 0x1c7   :  { %v3068_v59 = vpop.eup %2675 }
 0x1c8   :  { %2135 = vmatmul.mubr.f32.vlgmr.msra.gmra.mxu1 %v3068_v59 }
 0x1c9   :  { %2173 = vmatpush3.msra.mxu1 %v2767_v3  ;;  %2204 = vmatprep.mubr.msk.f32.mxu1 %vm2706_vm0, %v2705_v2 }
 0x1ca   :  { %2174 = vmatprep.subr.mxu1 %v2705_v2 }
 0x1cb   :  { %2175 = vmatpush3.msra.mxu1 %v2775_v4 }
 0x1cc   :  { %2176 = vmatprep.subr.mxu1 %v2705_v2 }
 0x1cd   :  { %2177 = vmatpush3.msra.mxu1 %v2784_v6 }
 0x1ce   :  { %2178 = vmatprep.subr.mxu1 %v2705_v2 }
 0x1cf   :  { %2179 = vmatpush3.msra.mxu1 %v2794_v8 }
 0x1d0   :  { %2180 = vmatprep.subr.mxu1 %v2705_v2 }
 0x1d1   :  { %2181 = vmatpush3.msra.mxu1 %v2804_v10 }
 0x1d2   :  { %2182 = vmatprep.subr.mxu1 %v2705_v2 }
 0x1d3   :  { %2183 = vmatpush3.msra.mxu1 %v2814_v12 }
 0x1d4   :  { %2184 = vmatprep.subr.mxu1 %v2705_v2 }
 0x1d5   :  { %2185 = vmatpush3.msra.mxu1 %v2824_v14 }
 0x1d6   :  { %2186 = vmatprep.subr.mxu1 %v2705_v2 }
 0x1d7   :  { %2187 = vmatpush3.msra.mxu1 %v2834_v16 }
 0x1d8   :  { %2188 = vmatprep.subr.mxu1 %v2705_v2 }
 0x1d9   :  { %2189 = vmatpush3.msra.mxu1 %v2844_v18 }
 0x1da   :  { %2190 = vmatprep.subr.mxu1 %v2705_v2 }
 0x1db   :  { %2191 = vmatpush3.msra.mxu1 %v2854_v20 }
 0x1dc   :  { %2192 = vmatprep.subr.mxu1 %v2705_v2 }
 0x1dd   :  { %2193 = vmatpush3.msra.mxu1 %v2864_v22 }
 0x1de   :  { %2194 = vmatprep.subr.mxu1 %v2705_v2 }
 0x1df   :  { %2195 = vmatpush3.msra.mxu1 %v2874_v24 }
 0x1e0   :  { %2196 = vmatprep.subr.mxu1 %v2705_v2 }
 0x1e1   :  { %2197 = vmatpush3.msra.mxu1 %v2884_v26 }
 0x1e2   :  { %2198 = vmatprep.subr.mxu1 %v2705_v2 }
 0x1e3   :  { %2199 = vmatpush3.msra.mxu1 %v2894_v28 }
 0x1e4   :  { %2200 = vmatprep.subr.mxu1 %v2705_v2 }
 0x1e5   :  { %2201 = vmatpush3.msra.mxu1 %v2908_v31 }
 0x1e6   :  { %2202 = vmatprep.subr.mxu1 %v2705_v2 }
 0x1e7   :  { %2203 = vmatpush3.msra.mxu1 %v2917_v33 }
 0x1e8   :  { %2242 = vmatprep.subr.mxu1 %v2705_v2 }
 0x288   :  { %v416_v61 = vpop.f32.mrf.mxu1 }
 0x289   :  { %v420_v62 = vadd.f32 %v416_v61, %v146_v60 }
 0x28a   :  { %v2136_v63 = vpop.f32.mrf.mxu1 }
 0x28b   :  { %2677 = vtanh.f32 %v420_v62  ;;  %v3466_v63 = vld [vmem:[%s3737_s6] ss:$0 sm:$0xff] }
 0x298   :  { %v3106_v0 = vpop.eup %2677 }
 0x299   :  { %2170 = vmatmul.mubr.f32.vlgmr.msra.gmra.mxu0 %v3106_v0 }
 0x29a   :  { %2208 = vmatpush3.msra.mxu0 %v2767_v3  ;;  %2239 = vmatprep.mubr.msk.f32.mxu0 %vm2706_vm0, %v2705_v2 }
 0x29b   :  { %2209 = vmatprep.subr.mxu0 %v2705_v2 }
 0x29c   :  { %2210 = vmatpush3.msra.mxu0 %v2775_v4 }
 0x29d   :  { %2211 = vmatprep.subr.mxu0 %v2705_v2 }
 0x29e   :  { %2212 = vmatpush3.msra.mxu0 %v2784_v6 }
 0x29f   :  { %2213 = vmatprep.subr.mxu0 %v2705_v2 }
 0x2a0   :  { %2214 = vmatpush3.msra.mxu0 %v2794_v8 }
 0x2a1   :  { %2215 = vmatprep.subr.mxu0 %v2705_v2 }
 0x2a2   :  { %2216 = vmatpush3.msra.mxu0 %v2804_v10 }
 0x2a3   :  { %2217 = vmatprep.subr.mxu0 %v2705_v2 }
 0x2a4   :  { %2218 = vmatpush3.msra.mxu0 %v2814_v12 }
 0x2a5   :  { %2219 = vmatprep.subr.mxu0 %v2705_v2 }
 0x2a6   :  { %2220 = vmatpush3.msra.mxu0 %v2824_v14 }
 0x2a7   :  { %2221 = vmatprep.subr.mxu0 %v2705_v2 }
 0x2a8   :  { %2222 = vmatpush3.msra.mxu0 %v2834_v16 }
 0x2a9   :  { %2223 = vmatprep.subr.mxu0 %v2705_v2 }
 0x2aa   :  { %2224 = vmatpush3.msra.mxu0 %v2844_v18 }
 0x2ab   :  { %2225 = vmatprep.subr.mxu0 %v2705_v2 }
 0x2ac   :  { %2226 = vmatpush3.msra.mxu0 %v2854_v20 }
 0x2ad   :  { %2227 = vmatprep.subr.mxu0 %v2705_v2 }
 0x2ae   :  { %2228 = vmatpush3.msra.mxu0 %v2864_v22 }
 0x2af   :  { %2229 = vmatprep.subr.mxu0 %v2705_v2 }
 0x2b0   :  { %2230 = vmatpush3.msra.mxu0 %v2874_v24 }
 0x2b1   :  { %2231 = vmatprep.subr.mxu0 %v2705_v2 }
 0x2b2   :  { %2232 = vmatpush3.msra.mxu0 %v2884_v26 }
 0x2b3   :  { %2233 = vmatprep.subr.mxu0 %v2705_v2 }
 0x2b4   :  { %2234 = vmatpush3.msra.mxu0 %v2894_v28 }
 0x2b5   :  { %2235 = vmatprep.subr.mxu0 %v2705_v2 }
 0x2b6   :  { %2236 = vmatpush3.msra.mxu0 %v2908_v31 }
 0x2b7   :  { %2237 = vmatprep.subr.mxu0 %v2705_v2 }
 0x2b8   :  { %2238 = vmatpush3.msra.mxu0 %v2917_v33 }
 0x2b9   :  { %2277 = vmatprep.subr.mxu0 %v2705_v2 }
 0x359   :  { %v491_v5 = vpop.f32.mrf.mxu0 }
 0x35a   :  { %v495_v7 = vadd.f32 %v491_v5, %v151_v1 }
 0x35b   :  { %v2171_v9 = vpop.f32.mrf.mxu0 }
 0x35c   :  { %2679 = vtanh.f32 %v495_v7 }
 0x369   :  { %v3145_v11 = vpop.eup %2679 }
 0x36a   :  { %2205 = vmatmul.mubr.f32.vlgmr.msra.gmra.mxu1 %v3145_v11 }
 0x36b   :  { %2243 = vmatpush3.msra.mxu1 %v2767_v3  ;;  %2274 = vmatprep.mubr.msk.f32.mxu1 %vm2706_vm0, %v2705_v2 }
 0x36c   :  { %2244 = vmatprep.subr.mxu1 %v2705_v2 }
 0x36d   :  { %2245 = vmatpush3.msra.mxu1 %v2775_v4 }
 0x36e   :  { %2246 = vmatprep.subr.mxu1 %v2705_v2 }
 0x36f   :  { %2247 = vmatpush3.msra.mxu1 %v2784_v6 }
 0x370   :  { %2248 = vmatprep.subr.mxu1 %v2705_v2 }
 0x371   :  { %2249 = vmatpush3.msra.mxu1 %v2794_v8 }
 0x372   :  { %2250 = vmatprep.subr.mxu1 %v2705_v2 }
 0x373   :  { %2251 = vmatpush3.msra.mxu1 %v2804_v10 }
 0x374   :  { %2252 = vmatprep.subr.mxu1 %v2705_v2 }
 0x375   :  { %2253 = vmatpush3.msra.mxu1 %v2814_v12 }
 0x376   :  { %2254 = vmatprep.subr.mxu1 %v2705_v2 }
 0x377   :  { %2255 = vmatpush3.msra.mxu1 %v2824_v14 }
 0x378   :  { %2256 = vmatprep.subr.mxu1 %v2705_v2 }
 0x379   :  { %2257 = vmatpush3.msra.mxu1 %v2834_v16 }
 0x37a   :  { %2258 = vmatprep.subr.mxu1 %v2705_v2 }
 0x37b   :  { %2259 = vmatpush3.msra.mxu1 %v2844_v18 }
 0x37c   :  { %2260 = vmatprep.subr.mxu1 %v2705_v2 }
 0x37d   :  { %2261 = vmatpush3.msra.mxu1 %v2854_v20 }
 0x37e   :  { %2262 = vmatprep.subr.mxu1 %v2705_v2 }
 0x37f   :  { %2263 = vmatpush3.msra.mxu1 %v2864_v22 }
 0x380   :  { %2264 = vmatprep.subr.mxu1 %v2705_v2 }
 0x381   :  { %2265 = vmatpush3.msra.mxu1 %v2874_v24 }
 0x382   :  { %2266 = vmatprep.subr.mxu1 %v2705_v2 }
 0x383   :  { %2267 = vmatpush3.msra.mxu1 %v2884_v26 }
 0x384   :  { %2268 = vmatprep.subr.mxu1 %v2705_v2 }
 0x385   :  { %2269 = vmatpush3.msra.mxu1 %v2894_v28 }
 0x386   :  { %2270 = vmatprep.subr.mxu1 %v2705_v2 }
 0x387   :  { %2271 = vmatpush3.msra.mxu1 %v2908_v31 }
 0x388   :  { %2272 = vmatprep.subr.mxu1 %v2705_v2 }
 0x389   :  { %2273 = vmatpush3.msra.mxu1 %v2917_v33 }
 0x42a   :  { %v566_v15 = vpop.f32.mrf.mxu1 }
 0x42b   :  { %v570_v17 = vadd.f32 %v566_v15, %v156_v13 }
 0x42c   :  { %v2206_v19 = vpop.f32.mrf.mxu1 }
 0x42d   :  { %2681 = vtanh.f32 %v570_v17 }
 0x43a   :  { %v3183_v21 = vpop.eup %2681 }
 0x43b   :  { %2240 = vmatmul.mubr.f32.vlgmr.msra.gmra.mxu0 %v3183_v21 }
 0x43c   :  { %2278 = vmatpush3.msra.mxu0 %v2767_v3  ;;  %2309 = vmatprep.mubr.msk.f32.mxu0 %vm2706_vm0, %v2705_v2  ;;  %v822_v3 = vld [vmem:[%s3735_s2 + $0x78] sm:$0xff] }
 0x43d   :  { %2279 = vmatprep.subr.mxu0 %v2705_v2  ;;  %2312 = vmatprep.subr.mxu1 %v822_v3 }
 0x43e   :  { %2280 = vmatpush3.msra.mxu0 %v2775_v4  ;;  %v161_v4 = vadd.f32 %v3059_v51, %v3017_v43 }
 0x43f   :  { %2281 = vmatprep.subr.mxu0 %v2705_v2 }
 0x440   :  { %2282 = vmatpush3.msra.mxu0 %v2784_v6 }
 0x441   :  { %2283 = vmatprep.subr.mxu0 %v2705_v2 }
 0x442   :  { %2284 = vmatpush3.msra.mxu0 %v2794_v8 }
 0x443   :  { %2285 = vmatprep.subr.mxu0 %v2705_v2 }
 0x444   :  { %2286 = vmatpush3.msra.mxu0 %v2804_v10 }
 0x445   :  { %2287 = vmatprep.subr.mxu0 %v2705_v2 }
 0x446   :  { %2288 = vmatpush3.msra.mxu0 %v2814_v12 }
 0x447   :  { %2289 = vmatprep.subr.mxu0 %v2705_v2 }
 0x448   :  { %2290 = vmatpush3.msra.mxu0 %v2824_v14  ;;  %v821_v14 = vld [vmem:[%s3735_s2 + $0x70] sm:$0xff] }
 0x449   :  { %2291 = vmatprep.subr.mxu0 %v2705_v2 }
 0x44a   :  { %2292 = vmatpush3.msra.mxu0 %v2834_v16  ;;  %v820_v16 = vld [vmem:[%s3735_s2 + $0x68] sm:$0xff] }
 0x44b   :  { %2293 = vmatprep.subr.mxu0 %v2705_v2 }
 0x44c   :  { %2294 = vmatpush3.msra.mxu0 %v2844_v18  ;;  %v819_v18 = vld [vmem:[%s3735_s2 + $0x60] sm:$0xff] }
 0x44d   :  { %2295 = vmatprep.subr.mxu0 %v2705_v2 }
 0x44e   :  { %2296 = vmatpush3.msra.mxu0 %v2854_v20  ;;  %v818_v20 = vld [vmem:[%s3735_s2 + $0x58] sm:$0xff] }
 0x44f   :  { %2297 = vmatprep.subr.mxu0 %v2705_v2 }
 0x450   :  { %2298 = vmatpush3.msra.mxu0 %v2864_v22  ;;  %v817_v22 = vld [vmem:[%s3735_s2 + $0x50] sm:$0xff] }
 0x451   :  { %2299 = vmatprep.subr.mxu0 %v2705_v2 }
 0x452   :  { %2300 = vmatpush3.msra.mxu0 %v2874_v24  ;;  %v815_v24 = vld [vmem:[%s3735_s2 + $0x40] sm:$0xff] }
 0x453   :  { %2301 = vmatprep.subr.mxu0 %v2705_v2 }
 0x454   :  { %2302 = vmatpush3.msra.mxu0 %v2884_v26  ;;  %v813_v26 = vld [vmem:[%s3735_s2 + $0x30] sm:$0xff] }
 0x455   :  { %2303 = vmatprep.subr.mxu0 %v2705_v2 }
 0x456   :  { %2304 = vmatpush3.msra.mxu0 %v2894_v28  ;;  %v811_v28 = vld [vmem:[%s3735_s2 + $0x20] sm:$0xff] }
 0x457   :  { %2305 = vmatprep.subr.mxu0 %v2705_v2 }
 0x458   :  { %2306 = vmatpush3.msra.mxu0 %v2908_v31  ;;  %v808_v31 = vld [vmem:[%s3735_s2 + $0x8] sm:$0xff] }
 0x459   :  { %2307 = vmatprep.subr.mxu0 %v2705_v2 }
 0x45a   :  { %2308 = vmatpush3.msra.mxu0 %v2917_v33  ;;  %v3279_v33 = vld [vmem:[%s3736_s4 + $0x78] sm:$0xff] }
 0x45b   :  { %2356 = vmatprep.subr.mxu0 %v2705_v2 }
 0x4fb   :  { %v641_v6 = vpop.f32.mrf.mxu0 }
 0x4fc   :  { %v645_v8 = vadd.f32 %v641_v6, %v161_v4 }
 0x4fd   :  { %v2241_v10 = vpop.f32.mrf.mxu0 }
 0x4fe   :  { %2683 = vtanh.f32 %v645_v8 }
 0x50b   :  { %v2684_v12 = vpop.eup %2683 }
 0x50c   :  { %2275 = vmatmul.mubr.f32.vlgmr.msra.gmra.mxu1 %v2684_v12 }
 0x50d   :  { %2313 = vmatpush3.msra.mxu1 %v822_v3  ;;  %2344 = vmatprep.mubr.f32.mxu1 %v3020_v48  ;;  %v3376_v48 = vld [vmem:[%s3736_s4 + $0x8] sm:$0xff] }
 0x50e   :  { %2314 = vmatprep.subr.mxu1 %v821_v14 }
 0x50f   :  { %2315 = vmatpush3.msra.mxu1 %v821_v14 }
 0x510   :  { %2316 = vmatprep.subr.mxu1 %v820_v16 }
 0x511   :  { %2317 = vmatpush3.msra.mxu1 %v820_v16 }
 0x512   :  { %2318 = vmatprep.subr.mxu1 %v819_v18 }
 0x513   :  { %2319 = vmatpush3.msra.mxu1 %v819_v18 }
 0x514   :  { %2320 = vmatprep.subr.mxu1 %v818_v20 }
 0x515   :  { %2321 = vmatpush3.msra.mxu1 %v818_v20 }
 0x516   :  { %2322 = vmatprep.subr.mxu1 %v817_v22 }
 0x517   :  { %2323 = vmatpush3.msra.mxu1 %v817_v22 }
 0x518   :  { %2324 = vmatprep.subr.mxu1 %v816_v23 }
 0x519   :  { %2325 = vmatpush3.msra.mxu1 %v816_v23 }
 0x51a   :  { %2326 = vmatprep.subr.mxu1 %v815_v24 }
 0x51b   :  { %2327 = vmatpush3.msra.mxu1 %v815_v24 }
 0x51c   :  { %2328 = vmatprep.subr.mxu1 %v814_v25 }
 0x51d   :  { %2329 = vmatpush3.msra.mxu1 %v814_v25 }
 0x51e   :  { %2330 = vmatprep.subr.mxu1 %v813_v26 }
 0x51f   :  { %2331 = vmatpush3.msra.mxu1 %v813_v26 }
 0x520   :  { %2332 = vmatprep.subr.mxu1 %v812_v27 }
 0x521   :  { %2333 = vmatpush3.msra.mxu1 %v812_v27 }
 0x522   :  { %2334 = vmatprep.subr.mxu1 %v811_v28 }
 0x523   :  { %2335 = vmatpush3.msra.mxu1 %v811_v28 }
 0x524   :  { %2336 = vmatprep.subr.mxu1 %v810_v29 }
 0x525   :  { %2337 = vmatpush3.msra.mxu1 %v810_v29 }
 0x526   :  { %2338 = vmatprep.subr.mxu1 %v809_v30 }
 0x527   :  { %2339 = vmatpush3.msra.mxu1 %v809_v30 }
 0x528   :  { %2340 = vmatprep.subr.mxu1 %v808_v31 }
 0x529   :  { %2341 = vmatpush3.msra.mxu1 %v808_v31 }
 0x52a   :  { %2342 = vmatprep.subr.mxu1 %v807_v32 }
 0x52b   :  { %2343 = vmatpush3.msra.mxu1 %v807_v32 }
 0x52c   :  { %2345 = vmatmul.mubr.f32.vlgmr.msra.gmra.mxu1 %v3068_v59  ;;  %2391 = vmatprep.subr.mxu1 %v2705_v2 }
 0x52d   :  { %2347 = vmatprep.mubr.f32.mxu1 %v3106_v0  ;;  %2392 = vmatpush3.msra.mxu1 %v3279_v33 }
 0x52e   :  { %2393 = vmatprep.subr.mxu1 %v2705_v2 }
 0x52f   :  { %2394 = vmatpush3.msra.mxu1 %v3285_v34 }
 0x530   :  { %2348 = vmatmul.mubr.f32.gmra.mxu1 %v3145_v11  ;;  %2395 = vmatprep.subr.mxu1 %v2705_v2 }
 0x531   :  { %2350 = vmatprep.mubr.f32.mxu1 %v3183_v21  ;;  %2396 = vmatpush3.msra.mxu1 %v3292_v35 }
 0x532   :  { %2397 = vmatprep.subr.mxu1 %v2705_v2 }
 0x533   :  { %2398 = vmatpush3.msra.mxu1 %v3299_v36 }
 0x534   :  { %2351 = vmatmul.mubr.f32.gmra.mxu1 %v2684_v12  ;;  %2399 = vmatprep.subr.mxu1 %v2705_v2 }
 0x535   :  { %2400 = vmatpush3.msra.mxu1 %v3306_v37 }
 0x536   :  { %2401 = vmatprep.subr.mxu1 %v2705_v2 }
 0x537   :  { %2402 = vmatpush3.msra.mxu1 %v3313_v38 }
 0x538   :  { %2403 = vmatprep.subr.mxu1 %v2705_v2 }
 0x539   :  { %2404 = vmatpush3.msra.mxu1 %v3320_v39 }
 0x53a   :  { %2405 = vmatprep.subr.mxu1 %v2705_v2 }
 0x53b   :  { %2406 = vmatpush3.msra.mxu1 %v3327_v40 }
 0x53c   :  { %2407 = vmatprep.subr.mxu1 %v2705_v2 }
 0x53d   :  { %2408 = vmatpush3.msra.mxu1 %v3334_v41 }
 0x53e   :  { %2409 = vmatprep.subr.mxu1 %v2705_v2 }
 0x53f   :  { %2410 = vmatpush3.msra.mxu1 %v3341_v42 }
 0x540   :  { %2411 = vmatprep.subr.mxu1 %v2705_v2 }
 0x541   :  { %2412 = vmatpush3.msra.mxu1 %v3348_v44 }
 0x542   :  { %2413 = vmatprep.subr.mxu1 %v2705_v2 }
 0x543   :  { %2414 = vmatpush3.msra.mxu1 %v3355_v45 }
 0x544   :  { %2415 = vmatprep.subr.mxu1 %v2705_v2 }
 0x545   :  { %2416 = vmatpush3.msra.mxu1 %v3362_v46 }
 0x546   :  { %2417 = vmatprep.subr.mxu1 %v2705_v2 }
 0x547   :  { %2418 = vmatpush3.msra.mxu1 %v3369_v47 }
 0x548   :  { %2419 = vmatprep.subr.mxu1 %v2705_v2 }
 0x549   :  { %2420 = vmatpush3.msra.mxu1 %v3376_v48 }
 0x54a   :  { %2421 = vmatprep.subr.mxu1 %v2705_v2 }
 0x54b   :  { %2422 = vmatpush3.msra.mxu1 %v3383_v49 }
 0x54c   :  { %2461 = vmatprep.subr.mxu1 %v2705_v2 }
 0x5cc   :  { %v716_v51 = vpop.f32.mrf.mxu1 }
 0x5cd   :  { %v720_v52 = vadd.f32 %v716_v51, %v166_v50  ;;  %v1556_v50 = vld [vmem:[%s3738_s7 + $0x30] sm:$0xff]  ;;  %v1555_v51 = vld [vmem:[%s3738_s7 + $0x28] sm:$0xff] }
 0x5ce   :  { %v2276_v55 = vpop.f32.mrf.mxu1 }
 0x5cf   :  { %2685 = vtanh.f32 %v720_v52  ;;  %v1554_v52 = vld [vmem:[%s3738_s7 + $0x20] sm:$0xff]  ;;  %v1553_v55 = vld [vmem:[%s3738_s7 + $0x18] sm:$0xff] }
 0x5dc   :  { %v2686_v56 = vpop.eup %2685 }
 0x5dd   :  { %2310 = vmatmul.mubr.f32.vlgmr.msra.gmra.mxu0 %v2686_v56  ;;  %2353 = vmatprep.mubr.f32.mxu1 %v2686_v56  ;;  %v1552_v56 = vld [vmem:[%s3738_s7 + $0x10] sm:$0xff] }
 0x5de   :  { %2357 = vmatpush3.msra.mxu0 %v3279_v33  ;;  %2388 = vmatprep.mubr.msk.f32.mxu0 %vm2706_vm0, %v2705_v2 }
 0x5df   :  { %2358 = vmatprep.subr.mxu0 %v2705_v2 }
 0x5e0   :  { %2359 = vmatpush3.msra.mxu0 %v3285_v34 }
 0x5e1   :  { %2360 = vmatprep.subr.mxu0 %v2705_v2 }
 0x5e2   :  { %2361 = vmatpush3.msra.mxu0 %v3292_v35 }
 0x5e3   :  { %2362 = vmatprep.subr.mxu0 %v2705_v2 }
 0x5e4   :  { %2363 = vmatpush3.msra.mxu0 %v3299_v36 }
 0x5e5   :  { %2364 = vmatprep.subr.mxu0 %v2705_v2 }
 0x5e6   :  { %2365 = vmatpush3.msra.mxu0 %v3306_v37 }
 0x5e7   :  { %2366 = vmatprep.subr.mxu0 %v2705_v2 }
 0x5e8   :  { %2367 = vmatpush3.msra.mxu0 %v3313_v38 }
 0x5e9   :  { %2368 = vmatprep.subr.mxu0 %v2705_v2 }
 0x5ea   :  { %2369 = vmatpush3.msra.mxu0 %v3320_v39 }
 0x5eb   :  { %2370 = vmatprep.subr.mxu0 %v2705_v2 }
 0x5ec   :  { %2371 = vmatpush3.msra.mxu0 %v3327_v40  ;;  %v2346_v61 = vpop.f32.mrf.mxu1 }
 0x5ed   :  { %2372 = vmatprep.subr.mxu0 %v2705_v2  ;;  %v902_v19 = vadd.f32 %v2346_v61, %v3466_v63 }
 0x5ee   :  { %2373 = vmatpush3.msra.mxu0 %v3334_v41  ;;  %v896_v62 = vpop.f32.mrf.mxu1 }
 0x5ef   :  { %2374 = vmatprep.subr.mxu0 %v2705_v2  ;;  %v897_v0 = vadd.f32 %v3466_v63, %v896_v62 }
 0x5f0   :  { %2375 = vmatpush3.msra.mxu0 %v3341_v42  ;;  %v3503_v7 = vpop.f32.mrf.mxu1 }
 0x5f1   :  { %2376 = vmatprep.subr.mxu0 %v2705_v2  ;;  %v912_v18 = vadd.f32 %v3503_v7, %v3466_v63 }
 0x5f2   :  { %2377 = vmatpush3.msra.mxu0 %v3348_v44  ;;  %v906_v9 = vpop.f32.mrf.mxu1 }
 0x5f3   :  { %2378 = vmatprep.subr.mxu0 %v2705_v2  ;;  %v907_v8 = vadd.f32 %v3466_v63, %v906_v9 }
 0x5f4   :  { %2379 = vmatpush3.msra.mxu0 %v3355_v45  ;;  %v3505_v11 = vpop.f32.mrf.mxu1 }
 0x5f5   :  { %2380 = vmatprep.subr.mxu0 %v2705_v2  ;;  %v922_v30 = vadd.f32 %v3505_v11, %v3466_v63 }
 0x5f6   :  { %2381 = vmatpush3.msra.mxu0 %v3362_v46  ;;  %v3507_v13 = vpop.f32.mrf.mxu1 }
 0x5f7   :  { %2382 = vmatprep.subr.mxu0 %v2705_v2  ;;  %v917_v25 = vadd.f32 %v3466_v63, %v3507_v13 }
 0x5f8   :  { %2383 = vmatpush3.msra.mxu0 %v3369_v47 }
 0x5f9   :  { %2384 = vmatprep.subr.mxu0 %v2705_v2 }
 0x5fa   :  { %2385 = vmatpush3.msra.mxu0 %v3376_v48 }
 0x5fb   :  { %2386 = vmatprep.subr.mxu0 %v2705_v2 }
 0x5fc   :  { %2387 = vmatpush3.msra.mxu0 %v3383_v49 }
 0x5fd   :  { %2389 = vmatmul.mubr.f32.vlgmr.msra.gmra.mxu0 %v2705_v2  ;;  %2426 = vmatprep.subr.mxu0 %v2705_v2 }
 0x5fe   :  { %2427 = vmatpush3.msra.mxu0 %v3279_v33  ;;  %2458 = vmatprep.mubr.msk.f32.mxu0 %vm2706_vm0, %v2705_v2 }
 0x5ff   :  { %2428 = vmatprep.subr.mxu0 %v2705_v2 }
 0x600   :  { %2429 = vmatpush3.msra.mxu0 %v3285_v34 }
 0x601   :  { %2430 = vmatprep.subr.mxu0 %v2705_v2 }
 0x602   :  { %2431 = vmatpush3.msra.mxu0 %v3292_v35 }
 0x603   :  { %2432 = vmatprep.subr.mxu0 %v2705_v2 }
 0x604   :  { %2433 = vmatpush3.msra.mxu0 %v3299_v36 }
 0x605   :  { %2434 = vmatprep.subr.mxu0 %v2705_v2 }
 0x606   :  { %2435 = vmatpush3.msra.mxu0 %v3306_v37 }
 0x607   :  { %2436 = vmatprep.subr.mxu0 %v2705_v2 }
 0x608   :  { %2437 = vmatpush3.msra.mxu0 %v3313_v38 }
 0x609   :  { %2438 = vmatprep.subr.mxu0 %v2705_v2 }
 0x60a   :  { %2439 = vmatpush3.msra.mxu0 %v3320_v39 }
 0x60b   :  { %2440 = vmatprep.subr.mxu0 %v2705_v2 }
 0x60c   :  { %2441 = vmatpush3.msra.mxu0 %v3327_v40 }
 0x60d   :  { %2442 = vmatprep.subr.mxu0 %v2705_v2 }
 0x60e   :  { %2443 = vmatpush3.msra.mxu0 %v3334_v41 }
 0x60f   :  { %2444 = vmatprep.subr.mxu0 %v2705_v2 }
 0x610   :  { %2445 = vmatpush3.msra.mxu0 %v3341_v42 }
 0x611   :  { %2446 = vmatprep.subr.mxu0 %v2705_v2 }
 0x612   :  { %2447 = vmatpush3.msra.mxu0 %v3348_v44 }
 0x613   :  { %2448 = vmatprep.subr.mxu0 %v2705_v2 }
 0x614   :  { %2449 = vmatpush3.msra.mxu0 %v3355_v45 }
 0x615   :  { %2450 = vmatprep.subr.mxu0 %v2705_v2 }
 0x616   :  { %2451 = vmatpush3.msra.mxu0 %v3362_v46 }
 0x617   :  { %2452 = vmatprep.subr.mxu0 %v2705_v2 }
 0x618   :  { %2453 = vmatpush3.msra.mxu0 %v3369_v47 }
 0x619   :  { %2454 = vmatprep.subr.mxu0 %v2705_v2 }
 0x61a   :  { %2455 = vmatpush3.msra.mxu0 %v3376_v48 }
 0x61b   :  { %2456 = vmatprep.subr.mxu0 %v2705_v2 }
 0x61c   :  { %2457 = vmatpush3.msra.mxu0 %v3383_v49 }
 0x61d   :  { %2496 = vmatprep.subr.mxu0 %v2705_v2 }
 0x69d   :  { %v791_v57 = vpop.f32.mrf.mxu0 }
 0x69e   :  { %v795_v58 = vadd.f32 %v791_v57, %v171_v54  ;;  %v1551_v54 = vld [vmem:[%s3738_s7 + $0x8] sm:$0xff]  ;;  %v1550_v57 = vld [vmem:[%s3738_s7] sm:$0xff] }
 0x69f   :  { %v2311_v59 = vpop.f32.mrf.mxu0 }
 0x6a0   :  { %2687 = vtanh.f32 %v795_v58 }
 0x6ad   :  { %v2688_v60 = vpop.eup %2687 }
 0x6ae   :  { %2354 = vmatmul.mubr.f32.gmra.mxu1 %v2688_v60 }
 0x6af   :  { %2423 = vmatprep.mubr.msk.f32.mxu1 %vm2706_vm0, %v2705_v2 }
 0x6bd   :  { %v1028_v1 = vpop.f32.mrf.mxu0 }
 0x6be   :  { %v1032_v43 = vadd.f32 %v1028_v1, %v897_v0  ;;  %v1650_v0 = vld [vmem:[%s3739_s8] ss:$0 sm:$0xff] }
 0x6bf   :  { %v2390_v53 = vpop.f32.mrf.mxu0 }
 0x6c0   :  { %2689 = vtanh.f32 %v1032_v43 }
 0x6cd   :  { %v2690_v5 = vpop.eup %2689 }
 0x6ce   :  { %2424 = vmatmul.mubr.f32.vlgmr.msra.gmra.mxu1 %v2690_v5 }
 0x6cf   :  { %2462 = vmatpush3.msra.mxu1 %v3279_v33  ;;  %2493 = vmatprep.mubr.msk.f32.mxu1 %vm2706_vm0, %v2705_v2 }
 0x6d0   :  { %2463 = vmatprep.subr.mxu1 %v2705_v2 }
 0x6d1   :  { %2464 = vmatpush3.msra.mxu1 %v3285_v34 }
 0x6d2   :  { %2465 = vmatprep.subr.mxu1 %v2705_v2 }
 0x6d3   :  { %2466 = vmatpush3.msra.mxu1 %v3292_v35 }
 0x6d4   :  { %2467 = vmatprep.subr.mxu1 %v2705_v2 }
 0x6d5   :  { %2468 = vmatpush3.msra.mxu1 %v3299_v36 }
 0x6d6   :  { %2469 = vmatprep.subr.mxu1 %v2705_v2 }
 0x6d7   :  { %2470 = vmatpush3.msra.mxu1 %v3306_v37 }
 0x6d8   :  { %2471 = vmatprep.subr.mxu1 %v2705_v2 }
 0x6d9   :  { %2472 = vmatpush3.msra.mxu1 %v3313_v38 }
 0x6da   :  { %2473 = vmatprep.subr.mxu1 %v2705_v2 }
 0x6db   :  { %2474 = vmatpush3.msra.mxu1 %v3320_v39 }
 0x6dc   :  { %2475 = vmatprep.subr.mxu1 %v2705_v2 }
 0x6dd   :  { %2476 = vmatpush3.msra.mxu1 %v3327_v40 }
 0x6de   :  { %2477 = vmatprep.subr.mxu1 %v2705_v2 }
 0x6df   :  { %2478 = vmatpush3.msra.mxu1 %v3334_v41 }
 0x6e0   :  { %2479 = vmatprep.subr.mxu1 %v2705_v2 }
 0x6e1   :  { %2480 = vmatpush3.msra.mxu1 %v3341_v42 }
 0x6e2   :  { %2481 = vmatprep.subr.mxu1 %v2705_v2 }
 0x6e3   :  { %2482 = vmatpush3.msra.mxu1 %v3348_v44 }
 0x6e4   :  { %2483 = vmatprep.subr.mxu1 %v2705_v2 }
 0x6e5   :  { %2484 = vmatpush3.msra.mxu1 %v3355_v45 }
 0x6e6   :  { %2485 = vmatprep.subr.mxu1 %v2705_v2 }
 0x6e7   :  { %2486 = vmatpush3.msra.mxu1 %v3362_v46 }
 0x6e8   :  { %2487 = vmatprep.subr.mxu1 %v2705_v2 }
 0x6e9   :  { %2488 = vmatpush3.msra.mxu1 %v3369_v47 }
 0x6ea   :  { %2489 = vmatprep.subr.mxu1 %v2705_v2 }
 0x6eb   :  { %2490 = vmatpush3.msra.mxu1 %v3376_v48 }
 0x6ec   :  { %2491 = vmatprep.subr.mxu1 %v2705_v2 }
 0x6ed   :  { %2492 = vmatpush3.msra.mxu1 %v3383_v49 }
 0x6ee   :  { %2531 = vmatprep.subr.mxu1 %v2705_v2 }
 0x76e   :  { %v3509_v15 = vpop.f32.mrf.mxu1 }
 0x76f   :  { %v932_v58 = vadd.f32 %v3509_v15, %v3466_v63 }
 0x770   :  { %v3511_v17 = vpop.f32.mrf.mxu1 }
 0x78e   :  { %v1101_v21 = vpop.f32.mrf.mxu1 }
 0x78f   :  { %v1105_v3 = vadd.f32 %v1101_v21, %v902_v19 }
 0x790   :  { %v2425_v4 = vpop.f32.mrf.mxu1 }
 0x791   :  { %2691 = vtanh.f32 %v1105_v3 }
 0x79e   :  { %v2692_v6 = vpop.eup %2691 }
 0x79f   :  { %2459 = vmatmul.mubr.f32.vlgmr.msra.gmra.mxu0 %v2692_v6 }
 0x7a0   :  { %2497 = vmatpush3.msra.mxu0 %v3279_v33  ;;  %2528 = vmatprep.mubr.msk.f32.mxu0 %vm2706_vm0, %v2705_v2 }
 0x7a1   :  { %2498 = vmatprep.subr.mxu0 %v2705_v2 }
 0x7a2   :  { %2499 = vmatpush3.msra.mxu0 %v3285_v34 }
 0x7a3   :  { %2500 = vmatprep.subr.mxu0 %v2705_v2 }
 0x7a4   :  { %2501 = vmatpush3.msra.mxu0 %v3292_v35 }
 0x7a5   :  { %2502 = vmatprep.subr.mxu0 %v2705_v2 }
 0x7a6   :  { %2503 = vmatpush3.msra.mxu0 %v3299_v36 }
 0x7a7   :  { %2504 = vmatprep.subr.mxu0 %v2705_v2 }
 0x7a8   :  { %2505 = vmatpush3.msra.mxu0 %v3306_v37 }
 0x7a9   :  { %2506 = vmatprep.subr.mxu0 %v2705_v2 }
 0x7aa   :  { %2507 = vmatpush3.msra.mxu0 %v3313_v38 }
 0x7ab   :  { %2508 = vmatprep.subr.mxu0 %v2705_v2 }
 0x7ac   :  { %2509 = vmatpush3.msra.mxu0 %v3320_v39 }
 0x7ad   :  { %2510 = vmatprep.subr.mxu0 %v2705_v2 }
 0x7ae   :  { %2511 = vmatpush3.msra.mxu0 %v3327_v40 }
 0x7af   :  { %2512 = vmatprep.subr.mxu0 %v2705_v2 }
 0x7b0   :  { %2513 = vmatpush3.msra.mxu0 %v3334_v41 }
 0x7b1   :  { %2514 = vmatprep.subr.mxu0 %v2705_v2 }
 0x7b2   :  { %2515 = vmatpush3.msra.mxu0 %v3341_v42 }
 0x7b3   :  { %2516 = vmatprep.subr.mxu0 %v2705_v2 }
 0x7b4   :  { %2517 = vmatpush3.msra.mxu0 %v3348_v44 }
 0x7b5   :  { %2518 = vmatprep.subr.mxu0 %v2705_v2 }
 0x7b6   :  { %2519 = vmatpush3.msra.mxu0 %v3355_v45 }
 0x7b7   :  { %2520 = vmatprep.subr.mxu0 %v2705_v2 }
 0x7b8   :  { %2521 = vmatpush3.msra.mxu0 %v3362_v46 }
 0x7b9   :  { %2522 = vmatprep.subr.mxu0 %v2705_v2 }
 0x7ba   :  { %2523 = vmatpush3.msra.mxu0 %v3369_v47 }
 0x7bb   :  { %2524 = vmatprep.subr.mxu0 %v2705_v2 }
 0x7bc   :  { %2525 = vmatpush3.msra.mxu0 %v3376_v48 }
 0x7bd   :  { %2526 = vmatprep.subr.mxu0 %v2705_v2 }
 0x7be   :  { %2527 = vmatpush3.msra.mxu0 %v3383_v49 }
 0x7bf   :  { %2566 = vmatprep.subr.mxu0 %v2705_v2 }
 0x85f   :  { %v1174_v10 = vpop.f32.mrf.mxu0 }
 0x860   :  { %v1178_v12 = vadd.f32 %v1174_v10, %v907_v8 }
 0x861   :  { %v2460_v14 = vpop.f32.mrf.mxu0 }
 0x862   :  { %2693 = vtanh.f32 %v1178_v12 }
 0x86f   :  { %v2694_v16 = vpop.eup %2693 }
 0x870   :  { %2494 = vmatmul.mubr.f32.vlgmr.msra.gmra.mxu1 %v2694_v16 }
 0x871   :  { %2532 = vmatpush3.msra.mxu1 %v3279_v33  ;;  %2563 = vmatprep.mubr.msk.f32.mxu1 %vm2706_vm0, %v2705_v2 }
 0x872   :  { %2533 = vmatprep.subr.mxu1 %v2705_v2 }
 0x873   :  { %2534 = vmatpush3.msra.mxu1 %v3285_v34 }
 0x874   :  { %2535 = vmatprep.subr.mxu1 %v2705_v2 }
 0x875   :  { %2536 = vmatpush3.msra.mxu1 %v3292_v35 }
 0x876   :  { %2537 = vmatprep.subr.mxu1 %v2705_v2 }
 0x877   :  { %2538 = vmatpush3.msra.mxu1 %v3299_v36 }
 0x878   :  { %2539 = vmatprep.subr.mxu1 %v2705_v2 }
 0x879   :  { %2540 = vmatpush3.msra.mxu1 %v3306_v37 }
 0x87a   :  { %2541 = vmatprep.subr.mxu1 %v2705_v2 }
 0x87b   :  { %2542 = vmatpush3.msra.mxu1 %v3313_v38 }
 0x87c   :  { %2543 = vmatprep.subr.mxu1 %v2705_v2 }
 0x87d   :  { %2544 = vmatpush3.msra.mxu1 %v3320_v39 }
 0x87e   :  { %2545 = vmatprep.subr.mxu1 %v2705_v2 }
 0x87f   :  { %2546 = vmatpush3.msra.mxu1 %v3327_v40 }
 0x880   :  { %2547 = vmatprep.subr.mxu1 %v2705_v2 }
 0x881   :  { %2548 = vmatpush3.msra.mxu1 %v3334_v41 }
 0x882   :  { %2549 = vmatprep.subr.mxu1 %v2705_v2 }
 0x883   :  { %2550 = vmatpush3.msra.mxu1 %v3341_v42 }
 0x884   :  { %2551 = vmatprep.subr.mxu1 %v2705_v2 }
 0x885   :  { %2552 = vmatpush3.msra.mxu1 %v3348_v44 }
 0x886   :  { %2553 = vmatprep.subr.mxu1 %v2705_v2 }
 0x887   :  { %2554 = vmatpush3.msra.mxu1 %v3355_v45 }
 0x888   :  { %2555 = vmatprep.subr.mxu1 %v2705_v2 }
 0x889   :  { %2556 = vmatpush3.msra.mxu1 %v3362_v46 }
 0x88a   :  { %2557 = vmatprep.subr.mxu1 %v2705_v2 }
 0x88b   :  { %2558 = vmatpush3.msra.mxu1 %v3369_v47 }
 0x88c   :  { %2559 = vmatprep.subr.mxu1 %v2705_v2 }
 0x88d   :  { %2560 = vmatpush3.msra.mxu1 %v3376_v48 }
 0x88e   :  { %2561 = vmatprep.subr.mxu1 %v2705_v2 }
 0x88f   :  { %2562 = vmatpush3.msra.mxu1 %v3383_v49 }
 0x890   :  { %2601 = vmatprep.subr.mxu1 %v2705_v2 }
 0x930   :  { %v1247_v20 = vpop.f32.mrf.mxu1 }
 0x931   :  { %v1251_v22 = vadd.f32 %v1247_v20, %v912_v18 }
 0x932   :  { %v2495_v23 = vpop.f32.mrf.mxu1 }
 0x933   :  { %2695 = vtanh.f32 %v1251_v22 }
 0x940   :  { %v2696_v24 = vpop.eup %2695 }
 0x941   :  { %2529 = vmatmul.mubr.f32.vlgmr.msra.gmra.mxu0 %v2696_v24 }
 0x942   :  { %2567 = vmatpush3.msra.mxu0 %v3279_v33  ;;  %2598 = vmatprep.mubr.msk.f32.mxu0 %vm2706_vm0, %v2705_v2 }
 0x943   :  { %2568 = vmatprep.subr.mxu0 %v2705_v2 }
 0x944   :  { %2569 = vmatpush3.msra.mxu0 %v3285_v34 }
 0x945   :  { %2570 = vmatprep.subr.mxu0 %v2705_v2 }
 0x946   :  { %2571 = vmatpush3.msra.mxu0 %v3292_v35 }
 0x947   :  { %2572 = vmatprep.subr.mxu0 %v2705_v2 }
 0x948   :  { %2573 = vmatpush3.msra.mxu0 %v3299_v36 }
 0x949   :  { %2574 = vmatprep.subr.mxu0 %v2705_v2 }
 0x94a   :  { %2575 = vmatpush3.msra.mxu0 %v3306_v37 }
 0x94b   :  { %2576 = vmatprep.subr.mxu0 %v2705_v2 }
 0x94c   :  { %2577 = vmatpush3.msra.mxu0 %v3313_v38 }
 0x94d   :  { %2578 = vmatprep.subr.mxu0 %v2705_v2 }
 0x94e   :  { %2579 = vmatpush3.msra.mxu0 %v3320_v39 }
 0x94f   :  { %2580 = vmatprep.subr.mxu0 %v2705_v2 }
 0x950   :  { %2581 = vmatpush3.msra.mxu0 %v3327_v40 }
 0x951   :  { %2582 = vmatprep.subr.mxu0 %v2705_v2 }
 0x952   :  { %2583 = vmatpush3.msra.mxu0 %v3334_v41 }
 0x953   :  { %2584 = vmatprep.subr.mxu0 %v2705_v2 }
 0x954   :  { %2585 = vmatpush3.msra.mxu0 %v3341_v42 }
 0x955   :  { %2586 = vmatprep.subr.mxu0 %v2705_v2 }
 0x956   :  { %2587 = vmatpush3.msra.mxu0 %v3348_v44 }
 0x957   :  { %2588 = vmatprep.subr.mxu0 %v2705_v2 }
 0x958   :  { %2589 = vmatpush3.msra.mxu0 %v3355_v45 }
 0x959   :  { %2590 = vmatprep.subr.mxu0 %v2705_v2 }
 0x95a   :  { %2591 = vmatpush3.msra.mxu0 %v3362_v46 }
 0x95b   :  { %2592 = vmatprep.subr.mxu0 %v2705_v2 }
 0x95c   :  { %2593 = vmatpush3.msra.mxu0 %v3369_v47 }
 0x95d   :  { %2594 = vmatprep.subr.mxu0 %v2705_v2 }
 0x95e   :  { %2595 = vmatpush3.msra.mxu0 %v3376_v48 }
 0x95f   :  { %2596 = vmatprep.subr.mxu0 %v2705_v2 }
 0x960   :  { %2597 = vmatpush3.msra.mxu0 %v3383_v49 }
 0x961   :  { %2636 = vmatprep.subr.mxu0 %v2705_v2 }
 0xa01   :  { %v1320_v26 = vpop.f32.mrf.mxu0 }
 0xa02   :  { %v1324_v27 = vadd.f32 %v1320_v26, %v917_v25 }
 0xa03   :  { %v2530_v28 = vpop.f32.mrf.mxu0 }
 0xa04   :  { %2697 = vtanh.f32 %v1324_v27 }
 0xa11   :  { %v2698_v29 = vpop.eup %2697 }
 0xa12   :  { %2564 = vmatmul.mubr.f32.vlgmr.msra.gmra.mxu1 %v2698_v29 }
 0xa13   :  { %2602 = vmatpush3.msra.mxu1 %v3279_v33  ;;  %2633 = vmatprep.mubr.msk.f32.mxu1 %vm2706_vm0, %v2705_v2 }
 0xa14   :  { %2603 = vmatprep.subr.mxu1 %v2705_v2 }
 0xa15   :  { %2604 = vmatpush3.msra.mxu1 %v3285_v34 }
 0xa16   :  { %2605 = vmatprep.subr.mxu1 %v2705_v2 }
 0xa17   :  { %2606 = vmatpush3.msra.mxu1 %v3292_v35  ;;  %v1565_v35 = vld [vmem:[%s3738_s7 + $0x78] sm:$0xff] }
 0xa18   :  { %2607 = vmatprep.subr.mxu1 %v2705_v2 }
 0xa19   :  { %2608 = vmatpush3.msra.mxu1 %v3299_v36  ;;  %v1564_v36 = vld [vmem:[%s3738_s7 + $0x70] sm:$0xff] }
 0xa1a   :  { %2609 = vmatprep.subr.mxu1 %v2705_v2 }
 0xa1b   :  { %2610 = vmatpush3.msra.mxu1 %v3306_v37  ;;  %v1563_v37 = vld [vmem:[%s3738_s7 + $0x68] sm:$0xff] }
 0xa1c   :  { %2611 = vmatprep.subr.mxu1 %v2705_v2 }
 0xa1d   :  { %2612 = vmatpush3.msra.mxu1 %v3313_v38  ;;  %v1562_v38 = vld [vmem:[%s3738_s7 + $0x60] sm:$0xff] }
 0xa1e   :  { %2613 = vmatprep.subr.mxu1 %v2705_v2 }
 0xa1f   :  { %2614 = vmatpush3.msra.mxu1 %v3320_v39  ;;  %v1561_v39 = vld [vmem:[%s3738_s7 + $0x58] sm:$0xff] }
 0xa20   :  { %2615 = vmatprep.subr.mxu1 %v2705_v2 }
 0xa21   :  { %2616 = vmatpush3.msra.mxu1 %v3327_v40  ;;  %v1560_v40 = vld [vmem:[%s3738_s7 + $0x50] sm:$0xff] }
 0xa22   :  { %2617 = vmatprep.subr.mxu1 %v2705_v2 }
 0xa23   :  { %2618 = vmatpush3.msra.mxu1 %v3334_v41  ;;  %v1559_v41 = vld [vmem:[%s3738_s7 + $0x48] sm:$0xff] }
 0xa24   :  { %2619 = vmatprep.subr.mxu1 %v2705_v2 }
 0xa25   :  { %2620 = vmatpush3.msra.mxu1 %v3341_v42  ;;  %v927_v42 = vadd.f32 %v3466_v63, %v3511_v17 }
 0xa26   :  { %2621 = vmatprep.subr.mxu1 %v2705_v2 }
 0xa27   :  { %2622 = vmatpush3.msra.mxu1 %v3348_v44 }
 0xa28   :  { %2623 = vmatprep.subr.mxu1 %v2705_v2 }
 0xa29   :  { %2624 = vmatpush3.msra.mxu1 %v3355_v45 }
 0xa2a   :  { %2625 = vmatprep.subr.mxu1 %v2705_v2 }
 0xa2b   :  { %2626 = vmatpush3.msra.mxu1 %v3362_v46 }
 0xa2c   :  { %2627 = vmatprep.subr.mxu1 %v2705_v2 }
 0xa2d   :  { %2628 = vmatpush3.msra.mxu1 %v3369_v47 }
 0xa2e   :  { %2629 = vmatprep.subr.mxu1 %v2705_v2 }
 0xa2f   :  { %2630 = vmatpush3.msra.mxu1 %v3376_v48  ;;  %v1558_v48 = vld [vmem:[%s3738_s7 + $0x40] sm:$0xff] }
 0xa30   :  { %2631 = vmatprep.subr.mxu1 %v2705_v2 }
 0xa31   :  { %2632 = vmatpush3.msra.mxu1 %v3383_v49  ;;  %v1557_v49 = vld [vmem:[%s3738_s7 + $0x38] sm:$0xff] }
 0xad2   :  { %v1393_v31 = vpop.f32.mrf.mxu1 }
 0xad3   :  { %v1397_v32 = vadd.f32 %v1393_v31, %v922_v30 }
 0xad4   :  { %v2565_v33 = vpop.f32.mrf.mxu1 }
 0xad5   :  { %2699 = vtanh.f32 %v1397_v32 }
 0xae2   :  { %v2700_v34 = vpop.eup %2699 }
 0xae3   :  { %2599 = vmatmul.mubr.f32.vlgmr.msra.gmra.mxu0 %v2700_v34 }
 0xae4   :  { %2668 = vmatprep.mubr.msk.f32.mxu0 %vm2706_vm0, %v2705_v2  ;;  %2637 = vmatpush3.msra.mxu0 %v1565_v35 }
 0xae5   :  { %2638 = vmatprep.subr.mxu0 %v2705_v2 }
 0xae6   :  { %2639 = vmatpush3.msra.mxu0 %v1564_v36 }
 0xae7   :  { %2640 = vmatprep.subr.mxu0 %v2705_v2 }
 0xae8   :  { %2641 = vmatpush3.msra.mxu0 %v1563_v37 }
 0xae9   :  { %2642 = vmatprep.subr.mxu0 %v2705_v2 }
 0xaea   :  { %2643 = vmatpush3.msra.mxu0 %v1562_v38 }
 0xaeb   :  { %2644 = vmatprep.subr.mxu0 %v2705_v2 }
 0xaec   :  { %2645 = vmatpush3.msra.mxu0 %v1561_v39 }
 0xaed   :  { %2646 = vmatprep.subr.mxu0 %v2705_v2 }
 0xaee   :  { %2647 = vmatpush3.msra.mxu0 %v1560_v40 }
 0xaef   :  { %2648 = vmatprep.subr.mxu0 %v2705_v2 }
 0xaf0   :  { %2649 = vmatpush3.msra.mxu0 %v1559_v41 }
 0xaf1   :  { %2650 = vmatprep.subr.mxu0 %v2705_v2 }
 0xaf2   :  { %2651 = vmatpush3.msra.mxu0 %v1558_v48 }
 0xaf3   :  { %2652 = vmatprep.subr.mxu0 %v2705_v2 }
 0xaf4   :  { %2653 = vmatpush3.msra.mxu0 %v1557_v49 }
 0xaf5   :  { %2654 = vmatprep.subr.mxu0 %v2705_v2 }
 0xaf6   :  { %2655 = vmatpush3.msra.mxu0 %v1556_v50 }
 0xaf7   :  { %2656 = vmatprep.subr.mxu0 %v2705_v2 }
 0xaf8   :  { %2657 = vmatpush3.msra.mxu0 %v1555_v51 }
 0xaf9   :  { %2658 = vmatprep.subr.mxu0 %v2705_v2 }
 0xafa   :  { %2659 = vmatpush3.msra.mxu0 %v1554_v52 }
 0xafb   :  { %2660 = vmatprep.subr.mxu0 %v2705_v2 }
 0xafc   :  { %2661 = vmatpush3.msra.mxu0 %v1553_v55 }
 0xafd   :  { %2662 = vmatprep.subr.mxu0 %v2705_v2 }
 0xafe   :  { %2663 = vmatpush3.msra.mxu0 %v1552_v56 }
 0xaff   :  { %2664 = vmatprep.subr.mxu0 %v2705_v2 }
 0xb00   :  { %2665 = vmatpush3.msra.mxu0 %v1551_v54 }
 0xb01   :  { %2666 = vmatprep.subr.mxu0 %v2705_v2 }
 0xb02   :  { %2667 = vmatpush3.msra.mxu0 %v1550_v57 }
 0xba3   :  { %v1466_v44 = vpop.f32.mrf.mxu0 }
 0xba4   :  { %v1470_v45 = vadd.f32 %v1466_v44, %v927_v42 }
 0xba5   :  { %v2600_v46 = vpop.f32.mrf.mxu0 }
 0xba6   :  { %2701 = vtanh.f32 %v1470_v45 }
 0xbb3   :  { %v2702_v47 = vpop.eup %2701 }
 0xbb4   :  { %2634 = vmatmul.mubr.f32.vlgmr.msra.gmra.mxu1 %v2702_v47 }
 0xc74   :  { %v1539_v59 = vpop.f32.mrf.mxu1 }
 0xc75   :  { %v1543_v60 = vadd.f32 %v1539_v59, %v932_v58 }
 0xc76   :  { %v2635_v61 = vpop.f32.mrf.mxu1 }
 0xc77   :  { %2703 = vtanh.f32 %v1543_v60 }
 0xc84   :  { %v2704_v62 = vpop.eup %2703 }
 0xc85   :  { %2669 = vmatmul.mubr.f32.vlgmr.msra.gmra.mxu0 %v2704_v62 }
 0xd45   :  { %v1639_v1 = vpop.f32.mrf.mxu0 }
 0xd46   :  { %v1640_v43 = vadd.f32 %v1650_v0, %v1639_v1 }
 0xd47   :  { %v2670_v53 = vpop.f32.mrf.mxu0 }
 0xd48   :  { %1643 = vst [vmem:[%s3740_s9] sm:$0xff] %v1640_v43 }

</bundles_post_ra>
